<compile_context>
chip_gen: v6e
topology: v6e:2x2x1
jax: 0.10.0
libtpu: 0.0.40
codegen_flags: <defaults>
</compile_context>

<pallas_src>
import math
import jax
import jax.numpy as jnp
from jax.experimental import pallas as pl
from jax.experimental.pallas import tpu as pltpu

# ---------------- model config (small, synthetic) ----------------
B = 2            # batch
S = 8            # sequence length
E = 32           # hidden size (embedding_dim analogue of 768)
H = 2            # attention heads
D = E // H       # head dim
I = 64           # FFN intermediate
L = 2            # transformer layers
VOCAB = 64
MAX_POS = 16
M = B * S        # rows of one sentence's activation slab
N_SENT = 2       # sentence 1 / sentence 2

_SCALE = 1.0 / math.sqrt(D)
_NEG_INF = -1e9  # additive mask; exp(x - max) underflows to exactly 0 in f32


# ---------------- in-kernel helpers ----------------
def _mm(a, b):
    """MXU matmul: bf16 inputs, f32 accumulation."""
    return jnp.dot(a.astype(jnp.bfloat16), b.astype(jnp.bfloat16),
                   preferred_element_type=jnp.float32)


def _mm_nt(a, b):
    """a @ b.T via dot_general (no materialized transpose)."""
    return jax.lax.dot_general(
        a.astype(jnp.bfloat16), b.astype(jnp.bfloat16),
        dimension_numbers=(((1,), (1,)), ((), ())),
        preferred_element_type=jnp.float32)


def _layernorm(x, g, b):
    mean = jnp.mean(x, axis=-1, keepdims=True)
    xc = x - mean
    var = jnp.mean(xc * xc, axis=-1, keepdims=True)
    return xc * jax.lax.rsqrt(var + 1e-12) * g + b


def _gelu(x):
    # TODO(synk): HF BERT default is the exact erf GELU; tanh approximation is
    # used here since erf lowering in Mosaic is not guaranteed.
    c = math.sqrt(2.0 / math.pi)
    return 0.5 * x * (1.0 + jnp.tanh(c * (x + 0.044715 * x * x * x)))


# ---------------- fused encoder + scorer kernel (one sentence / grid step) ----------------
def fused_encoder_kernel(emb_ref, bias_ref, emb_g_ref, emb_b_ref,
                         wqkv_ref, bqkv_ref, wo_ref, bo_ref,
                         ln1_g_ref, ln1_b_ref,
                         w1_ref, b1_ref, w2_ref, b2_ref,
                         ln2_g_ref, ln2_b_ref, v_ref,
                         out_ref):
    x = emb_ref[0].astype(jnp.float32)      # (M, E) = (B*S, E)
    bias = bias_ref[0]                       # (M, M) additive attention bias (hoisted)
    x = _layernorm(x, emb_g_ref[...], emb_b_ref[...])

    for l in range(L):                       # static unrolled layer loop
        # ---- self-attention with fused QKV projection ----
        qkv = _mm(x, wqkv_ref[l]) + bqkv_ref[l]        # (M, 3E)
        q = qkv[:, 0:E] * _SCALE                       # scale folded into Q once
        k = qkv[:, E:2 * E]
        v = qkv[:, 2 * E:3 * E]

        heads = []
        for h in range(H):
            c0 = h * D
            # one (M, D) @ (D, M) matmul covers every batch row; the block-
            # diagonal bias kills cross-batch / masked-key attention exactly.
            s = _mm_nt(q[:, c0:c0 + D], k[:, c0:c0 + D]) + bias   # (M, M)
            s = s - jnp.max(s, axis=-1, keepdims=True)
            p = jnp.exp(s)
            p = p * pl.reciprocal(jnp.sum(p, axis=-1, keepdims=True), approx=True)
            heads.append(_mm(p, v[:, c0:c0 + D]))                 # (M, D)
        ctx = jnp.concatenate(heads, axis=-1)                     # (M, E)

        attn_out = _mm(ctx, wo_ref[l]) + bo_ref[l]
        x = _layernorm(attn_out + x, ln1_g_ref[l], ln1_b_ref[l])

        # ---- feed-forward ----
        h1 = _gelu(_mm(x, w1_ref[l]) + b1_ref[l])
        ffn_out = _mm(h1, w2_ref[l]) + b2_ref[l]
        x = _layernorm(ffn_out + x, ln2_g_ref[l], ln2_b_ref[l])

    # ---- CLS @ v scoring (fused into kernel tail) ----
    cls = jnp.concatenate([x[b * S:b * S + 1, :] for b in range(B)], axis=0)  # (B, E)
    score = jnp.sum(cls * v_ref[...], axis=-1, keepdims=True)                 # (B, 1)
    out_ref[0] = score.astype(out_ref.dtype)


# ---------------- BlockSpec helpers ----------------
def _const_spec(shape):
    nd = len(shape)
    return pl.BlockSpec(shape, lambda s: (0,) * nd)


def _sent_spec(block_shape):
    nd = len(block_shape)
    return pl.BlockSpec(block_shape, lambda s: (s,) + (0,) * (nd - 1))


# ---------------- parameter init (deterministic, synthetic) ----------------
def init_params(key):
    keys = iter(jax.random.split(key, 64))
    nrm = lambda shape: 0.02 * jax.random.normal(next(keys), shape, jnp.float32)
    # MXU weights live in bf16 (they were cast to bf16 in-kernel anyway);
    # halves weight DMA and removes the per-layer in-kernel cast.
    nrmb = lambda shape: nrm(shape).astype(jnp.bfloat16)

    params = {
        "word_emb": nrm((VOCAB, E)),
        "pos_emb": nrm((MAX_POS, E)),
        "type_emb": nrm((2, E)),
        "emb_ln_g": jnp.ones((1, E), jnp.float32),
        "emb_ln_b": jnp.zeros((1, E), jnp.float32),
        # per-layer weights stacked along a leading layer axis
        "wqkv": nrmb((L, E, 3 * E)), "bqkv": jnp.zeros((L, 1, 3 * E), jnp.float32),
        "wo": nrmb((L, E, E)), "bo": jnp.zeros((L, 1, E), jnp.float32),
        "ln1_g": jnp.ones((L, 1, E), jnp.float32), "ln1_b": jnp.zeros((L, 1, E), jnp.float32),
        "w1": nrmb((L, E, I)), "b1": jnp.zeros((L, 1, I), jnp.float32),
        "w2": nrmb((L, I, E)), "b2": jnp.zeros((L, 1, E), jnp.float32),
        "ln2_g": jnp.ones((L, 1, E), jnp.float32), "ln2_b": jnp.zeros((L, 1, E), jnp.float32),
    }
    # classifier vector v: xavier_uniform_(randn(E, 1)) -- stored as (1, E) row
    limit = math.sqrt(6.0 / (E + 1))
    params["v"] = jax.random.uniform(next(keys), (1, E), jnp.float32,
                                     minval=-limit, maxval=limit)
    return params


# ---------------- forward pass ----------------
def bert_binary_classifier_forward(params, ids_s1, mask_s1, ids_s2, mask_s2):
    ids = jnp.stack([ids_s1, ids_s2], axis=0)               # (2, B, S)
    masks = jnp.stack([mask_s1, mask_s2], axis=0)           # (2, B, S)

    # Embedding gathers are glue; everything else runs in the fused kernel.
    emb = (params["word_emb"][ids]
           + params["pos_emb"][jnp.arange(S)][None, None, :, :]
           + params["type_emb"][0][None, None, None, :])    # (2, B, S, E)
    emb = emb.reshape(N_SENT, M, E)

    # Per-sentence (M, M) additive attention bias: 0 where the query row may
    # attend the key column (same batch AND key unmasked), -1e9 otherwise.
    # The block-diagonal structure lets the kernel run attention for all B
    # batch rows with a single matmul per head (cross-batch softmax weights
    # underflow to exactly 0), matching per-batch attention exactly.
    batch_ids = jnp.repeat(jnp.arange(B), S)                        # (M,)
    same_batch = batch_ids[:, None] == batch_ids[None, :]           # (M, M)
    key_valid = masks.reshape(N_SENT, M).astype(bool)               # (2, M)
    allowed = same_batch[None, :, :] & key_valid[:, None, :]        # (2, M, M)
    bias2d = jnp.where(allowed, 0.0, _NEG_INF).astype(jnp.float32)

    scores = pl.pallas_call(
        fused_encoder_kernel,
        out_shape=jax.ShapeDtypeStruct((N_SENT, B, 1), jnp.float32),
        grid=(N_SENT,),
        in_specs=[
            _sent_spec((1, M, E)),                           # embeddings (per sentence)
            _sent_spec((1, M, M)),                           # attention bias (per sentence)
            _const_spec((1, E)), _const_spec((1, E)),        # emb LN g/b
            _const_spec((L, E, 3 * E)), _const_spec((L, 1, 3 * E)),   # wqkv/bqkv
            _const_spec((L, E, E)), _const_spec((L, 1, E)),            # wo/bo
            _const_spec((L, 1, E)), _const_spec((L, 1, E)),            # ln1 g/b
            _const_spec((L, E, I)), _const_spec((L, 1, I)),            # w1/b1
            _const_spec((L, I, E)), _const_spec((L, 1, E)),            # w2/b2
            _const_spec((L, 1, E)), _const_spec((L, 1, E)),            # ln2 g/b
            _const_spec((1, E)),                                       # v
        ],
        out_specs=_sent_spec((1, B, 1)),
        compiler_params=pltpu.CompilerParams(
            dimension_semantics=("parallel",)),              # 2 TCs on v7x
    )(emb, bias2d,
      params["emb_ln_g"], params["emb_ln_b"],
      params["wqkv"], params["bqkv"], params["wo"], params["bo"],
      params["ln1_g"], params["ln1_b"],
      params["w1"], params["b1"], params["w2"], params["b2"],
      params["ln2_g"], params["ln2_b"], params["v"])

    # (2, B, 1) -> (B, 2): column 0 = sentence-1 score, column 1 = sentence-2
    return jnp.swapaxes(scores[:, :, 0], 0, 1)


# ---------------- main ----------------
if __name__ == "__main__":
    key = jax.random.PRNGKey(0)
    kp, k1, k2 = jax.random.split(key, 3)
    params = init_params(kp)

    input_ids_s1 = jax.random.randint(k1, (B, S), 0, VOCAB, dtype=jnp.int32)
    input_ids_s2 = jax.random.randint(k2, (B, S), 0, VOCAB, dtype=jnp.int32)
    attention_mask_s1 = jnp.ones((B, S), jnp.int32)
    attention_mask_s2 = jnp.ones((B, S), jnp.int32).at[:, S - 2:].set(0)

    fwd = jax.jit(bert_binary_classifier_forward)
    logits = fwd(params, input_ids_s1, attention_mask_s1,
                 input_ids_s2, attention_mask_s2)
    jax.block_until_ready(logits)
    assert logits.shape == (B, 2) and logits.dtype == jnp.float32
    assert bool(jnp.all(jnp.isfinite(logits)))
    print("KERNEL_OK")
</pallas_src>

<mosaic_0001>
module attributes {stable_mosaic.version = 11 : i64} {
  func.func @fused_encoder_kernel(%arg0: i32, %arg1: memref<1x16x32xf32, #tpu.memory_space<vmem>>, %arg2: memref<1x16x16xf32, #tpu.memory_space<vmem>>, %arg3: memref<1x32xf32, #tpu.memory_space<vmem>>, %arg4: memref<1x32xf32, #tpu.memory_space<vmem>>, %arg5: memref<2x32x96xbf16, #tpu.memory_space<vmem>>, %arg6: memref<2x1x96xf32, #tpu.memory_space<vmem>>, %arg7: memref<2x32x32xbf16, #tpu.memory_space<vmem>>, %arg8: memref<2x1x32xf32, #tpu.memory_space<vmem>>, %arg9: memref<2x1x32xf32, #tpu.memory_space<vmem>>, %arg10: memref<2x1x32xf32, #tpu.memory_space<vmem>>, %arg11: memref<2x32x64xbf16, #tpu.memory_space<vmem>>, %arg12: memref<2x1x64xf32, #tpu.memory_space<vmem>>, %arg13: memref<2x64x32xbf16, #tpu.memory_space<vmem>>, %arg14: memref<2x1x32xf32, #tpu.memory_space<vmem>>, %arg15: memref<2x1x32xf32, #tpu.memory_space<vmem>>, %arg16: memref<2x1x32xf32, #tpu.memory_space<vmem>>, %arg17: memref<1x32xf32, #tpu.memory_space<vmem>>, %arg18: memref<1x2x1xf32, #tpu.memory_space<vmem>>) attributes {dimension_semantics = [#tpu.dimension_semantics<parallel>], iteration_bounds = array<i64: 2>, scalar_prefetch = 0 : i64, scratch_operands = 0 : i64, tpu.core_type = #tpu.core_type<tc>, window_params = [{transform_indices = @transform_0, window_bounds = array<i64: 1, 16, 32>}, {transform_indices = @transform_1, window_bounds = array<i64: 1, 16, 16>}, {pipeline_mode = #tpu.pipeline_mode<synchronous>, transform_indices = @transform_2, window_bounds = array<i64: 1, 32>}, {pipeline_mode = #tpu.pipeline_mode<synchronous>, transform_indices = @transform_3, window_bounds = array<i64: 1, 32>}, {pipeline_mode = #tpu.pipeline_mode<synchronous>, transform_indices = @transform_4, window_bounds = array<i64: 2, 32, 96>}, {pipeline_mode = #tpu.pipeline_mode<synchronous>, transform_indices = @transform_5, window_bounds = array<i64: 2, 1, 96>}, {pipeline_mode = #tpu.pipeline_mode<synchronous>, transform_indices = @transform_6, window_bounds = array<i64: 2, 32, 32>}, {pipeline_mode = #tpu.pipeline_mode<synchronous>, transform_indices = @transform_7, window_bounds = array<i64: 2, 1, 32>}, {pipeline_mode = #tpu.pipeline_mode<synchronous>, transform_indices = @transform_8, window_bounds = array<i64: 2, 1, 32>}, {pipeline_mode = #tpu.pipeline_mode<synchronous>, transform_indices = @transform_9, window_bounds = array<i64: 2, 1, 32>}, {pipeline_mode = #tpu.pipeline_mode<synchronous>, transform_indices = @transform_10, window_bounds = array<i64: 2, 32, 64>}, {pipeline_mode = #tpu.pipeline_mode<synchronous>, transform_indices = @transform_11, window_bounds = array<i64: 2, 1, 64>}, {pipeline_mode = #tpu.pipeline_mode<synchronous>, transform_indices = @transform_12, window_bounds = array<i64: 2, 64, 32>}, {pipeline_mode = #tpu.pipeline_mode<synchronous>, transform_indices = @transform_13, window_bounds = array<i64: 2, 1, 32>}, {pipeline_mode = #tpu.pipeline_mode<synchronous>, transform_indices = @transform_14, window_bounds = array<i64: 2, 1, 32>}, {pipeline_mode = #tpu.pipeline_mode<synchronous>, transform_indices = @transform_15, window_bounds = array<i64: 2, 1, 32>}, {pipeline_mode = #tpu.pipeline_mode<synchronous>, transform_indices = @transform_16, window_bounds = array<i64: 1, 32>}, {transform_indices = @transform_17, window_bounds = array<i64: 1, 2, 1>}]} {
    %c0 = arith.constant 0 : index
    %c0_0 = arith.constant 0 : index
    %c0_1 = arith.constant 0 : index
    %0 = vector.load %arg1[%c0, %c0_0, %c0_1] : memref<1x16x32xf32, #tpu.memory_space<vmem>>, vector<1x16x32xf32>
    %1 = vector.shape_cast %0 : vector<1x16x32xf32> to vector<16x32xf32>
    %c0_2 = arith.constant 0 : index
    %c0_3 = arith.constant 0 : index
    %c0_4 = arith.constant 0 : index
    %2 = vector.load %arg2[%c0_2, %c0_3, %c0_4] : memref<1x16x16xf32, #tpu.memory_space<vmem>>, vector<1x16x16xf32>
    %3 = vector.shape_cast %2 : vector<1x16x16xf32> to vector<16x16xf32>
    %c0_5 = arith.constant 0 : index
    %c0_6 = arith.constant 0 : index
    %4 = vector.load %arg3[%c0_5, %c0_6] : memref<1x32xf32, #tpu.memory_space<vmem>>, vector<1x32xf32>
    %c0_7 = arith.constant 0 : index
    %c0_8 = arith.constant 0 : index
    %5 = vector.load %arg4[%c0_7, %c0_8] : memref<1x32xf32, #tpu.memory_space<vmem>>, vector<1x32xf32>
    %cst = arith.constant dense<0.000000e+00> : vector<16xf32>
    %6 = vector.multi_reduction <add>, %1, %cst [1] : vector<16x32xf32> to vector<16xf32>
    %7 = vector.shape_cast %6 : vector<16xf32> to vector<16x1xf32>
    %cst_9 = arith.constant 3.200000e+01 : f32
    %8 = vector.broadcast %cst_9 : f32 to vector<16x1xf32>
    %9 = arith.divf %7, %8 : vector<16x1xf32>
    %10 = vector.broadcast %9 : vector<16x1xf32> to vector<16x32xf32>
    %11 = arith.subf %1, %10 : vector<16x32xf32>
    %12 = arith.mulf %11, %11 : vector<16x32xf32>
    %cst_10 = arith.constant dense<0.000000e+00> : vector<16xf32>
    %13 = vector.multi_reduction <add>, %12, %cst_10 [1] : vector<16x32xf32> to vector<16xf32>
    %14 = vector.shape_cast %13 : vector<16xf32> to vector<16x1xf32>
    %cst_11 = arith.constant 3.200000e+01 : f32
    %15 = vector.broadcast %cst_11 : f32 to vector<16x1xf32>
    %16 = arith.divf %14, %15 : vector<16x1xf32>
    %cst_12 = arith.constant 9.99999996E-13 : f32
    %17 = vector.broadcast %cst_12 : f32 to vector<16x1xf32>
    %18 = arith.addf %16, %17 : vector<16x1xf32>
    %19 = math.rsqrt %18 : vector<16x1xf32>
    %20 = vector.broadcast %19 : vector<16x1xf32> to vector<16x32xf32>
    %21 = arith.mulf %11, %20 : vector<16x32xf32>
    %22 = vector.broadcast %4 : vector<1x32xf32> to vector<16x32xf32>
    %23 = arith.mulf %21, %22 : vector<16x32xf32>
    %24 = vector.broadcast %5 : vector<1x32xf32> to vector<16x32xf32>
    %25 = arith.addf %23, %24 : vector<16x32xf32>
    %c0_13 = arith.constant 0 : index
    %c0_14 = arith.constant 0 : index
    %c0_15 = arith.constant 0 : index
    %26 = vector.load %arg5[%c0_13, %c0_14, %c0_15] : memref<2x32x96xbf16, #tpu.memory_space<vmem>>, vector<1x32x96xbf16>
    %27 = vector.shape_cast %26 : vector<1x32x96xbf16> to vector<32x96xbf16>
    %28 = arith.truncf %25 : vector<16x32xf32> to vector<16x32xbf16>
    %cst_16 = arith.constant dense<0.000000e+00> : vector<16x96xf32>
    %29 = tpu.matmul %28, %27, %cst_16 {dimension_numbers = #tpu.dot_dimension_numbers<[1], [0], [0], [1], [0, 0, 1, 1], [], []>} : vector<16x32xbf16>, vector<32x96xbf16>, vector<16x96xf32> -> vector<16x96xf32>
    %c0_17 = arith.constant 0 : index
    %c0_18 = arith.constant 0 : index
    %c0_19 = arith.constant 0 : index
    %30 = vector.load %arg6[%c0_17, %c0_18, %c0_19] : memref<2x1x96xf32, #tpu.memory_space<vmem>>, vector<1x1x96xf32>
    %31 = vector.shape_cast %30 : vector<1x1x96xf32> to vector<1x96xf32>
    %32 = vector.broadcast %31 : vector<1x96xf32> to vector<16x96xf32>
    %33 = arith.addf %29, %32 : vector<16x96xf32>
    %34 = vector.extract_strided_slice %33 {offsets = [0, 0], sizes = [16, 32], strides = [1, 1]} : vector<16x96xf32> to vector<16x32xf32>
    %cst_20 = arith.constant 2.500000e-01 : f32
    %35 = vector.broadcast %cst_20 : f32 to vector<16x32xf32>
    %36 = arith.mulf %34, %35 : vector<16x32xf32>
    %37 = vector.extract_strided_slice %33 {offsets = [0, 32], sizes = [16, 32], strides = [1, 1]} : vector<16x96xf32> to vector<16x32xf32>
    %38 = vector.extract_strided_slice %33 {offsets = [0, 64], sizes = [16, 32], strides = [1, 1]} : vector<16x96xf32> to vector<16x32xf32>
    %39 = vector.extract_strided_slice %36 {offsets = [0, 0], sizes = [16, 16], strides = [1, 1]} : vector<16x32xf32> to vector<16x16xf32>
    %40 = vector.extract_strided_slice %37 {offsets = [0, 0], sizes = [16, 16], strides = [1, 1]} : vector<16x32xf32> to vector<16x16xf32>
    %41 = arith.truncf %39 : vector<16x16xf32> to vector<16x16xbf16>
    %42 = arith.truncf %40 : vector<16x16xf32> to vector<16x16xbf16>
    %cst_21 = arith.constant dense<0.000000e+00> : vector<16x16xf32>
    %43 = tpu.matmul %41, %42, %cst_21 {dimension_numbers = #tpu.dot_dimension_numbers<[1], [1], [0], [0], [0, 0, 1, 0], [], []>} : vector<16x16xbf16>, vector<16x16xbf16>, vector<16x16xf32> -> vector<16x16xf32>
    %44 = arith.addf %43, %3 : vector<16x16xf32>
    %cst_22 = arith.constant dense<0xFF800000> : vector<16xf32>
    %45 = vector.multi_reduction <maximumf>, %44, %cst_22 [1] : vector<16x16xf32> to vector<16xf32>
    %46 = vector.shape_cast %45 : vector<16xf32> to vector<16x1xf32>
    %47 = vector.broadcast %46 : vector<16x1xf32> to vector<16x16xf32>
    %48 = arith.subf %44, %47 : vector<16x16xf32>
    %49 = math.exp %48 : vector<16x16xf32>
    %cst_23 = arith.constant dense<0.000000e+00> : vector<16xf32>
    %50 = vector.multi_reduction <add>, %49, %cst_23 [1] : vector<16x16xf32> to vector<16xf32>
    %51 = vector.shape_cast %50 : vector<16xf32> to vector<16x1xf32>
    %52 = tpu.reciprocal %51 {approx = true} : vector<16x1xf32> -> vector<16x1xf32>
    %53 = vector.broadcast %52 : vector<16x1xf32> to vector<16x16xf32>
    %54 = arith.mulf %49, %53 : vector<16x16xf32>
    %55 = vector.extract_strided_slice %38 {offsets = [0, 0], sizes = [16, 16], strides = [1, 1]} : vector<16x32xf32> to vector<16x16xf32>
    %56 = arith.truncf %54 : vector<16x16xf32> to vector<16x16xbf16>
    %57 = arith.truncf %55 : vector<16x16xf32> to vector<16x16xbf16>
    %cst_24 = arith.constant dense<0.000000e+00> : vector<16x16xf32>
    %58 = tpu.matmul %56, %57, %cst_24 {dimension_numbers = #tpu.dot_dimension_numbers<[1], [0], [0], [1], [0, 0, 1, 1], [], []>} : vector<16x16xbf16>, vector<16x16xbf16>, vector<16x16xf32> -> vector<16x16xf32>
    %59 = vector.extract_strided_slice %36 {offsets = [0, 16], sizes = [16, 16], strides = [1, 1]} : vector<16x32xf32> to vector<16x16xf32>
    %60 = vector.extract_strided_slice %37 {offsets = [0, 16], sizes = [16, 16], strides = [1, 1]} : vector<16x32xf32> to vector<16x16xf32>
    %61 = arith.truncf %59 : vector<16x16xf32> to vector<16x16xbf16>
    %62 = arith.truncf %60 : vector<16x16xf32> to vector<16x16xbf16>
    %cst_25 = arith.constant dense<0.000000e+00> : vector<16x16xf32>
    %63 = tpu.matmul %61, %62, %cst_25 {dimension_numbers = #tpu.dot_dimension_numbers<[1], [1], [0], [0], [0, 0, 1, 0], [], []>} : vector<16x16xbf16>, vector<16x16xbf16>, vector<16x16xf32> -> vector<16x16xf32>
    %64 = arith.addf %63, %3 : vector<16x16xf32>
    %cst_26 = arith.constant dense<0xFF800000> : vector<16xf32>
    %65 = vector.multi_reduction <maximumf>, %64, %cst_26 [1] : vector<16x16xf32> to vector<16xf32>
    %66 = vector.shape_cast %65 : vector<16xf32> to vector<16x1xf32>
    %67 = vector.broadcast %66 : vector<16x1xf32> to vector<16x16xf32>
    %68 = arith.subf %64, %67 : vector<16x16xf32>
    %69 = math.exp %68 : vector<16x16xf32>
    %cst_27 = arith.constant dense<0.000000e+00> : vector<16xf32>
    %70 = vector.multi_reduction <add>, %69, %cst_27 [1] : vector<16x16xf32> to vector<16xf32>
    %71 = vector.shape_cast %70 : vector<16xf32> to vector<16x1xf32>
    %72 = tpu.reciprocal %71 {approx = true} : vector<16x1xf32> -> vector<16x1xf32>
    %73 = vector.broadcast %72 : vector<16x1xf32> to vector<16x16xf32>
    %74 = arith.mulf %69, %73 : vector<16x16xf32>
    %75 = vector.extract_strided_slice %38 {offsets = [0, 16], sizes = [16, 16], strides = [1, 1]} : vector<16x32xf32> to vector<16x16xf32>
    %76 = arith.truncf %74 : vector<16x16xf32> to vector<16x16xbf16>
    %77 = arith.truncf %75 : vector<16x16xf32> to vector<16x16xbf16>
    %cst_28 = arith.constant dense<0.000000e+00> : vector<16x16xf32>
    %78 = tpu.matmul %76, %77, %cst_28 {dimension_numbers = #tpu.dot_dimension_numbers<[1], [0], [0], [1], [0, 0, 1, 1], [], []>} : vector<16x16xbf16>, vector<16x16xbf16>, vector<16x16xf32> -> vector<16x16xf32>
    %79 = tpu.concatenate %58, %78 in 1 : vector<16x16xf32>, vector<16x16xf32> -> vector<16x32xf32>
    %c0_29 = arith.constant 0 : index
    %c0_30 = arith.constant 0 : index
    %c0_31 = arith.constant 0 : index
    %80 = vector.load %arg7[%c0_29, %c0_30, %c0_31] : memref<2x32x32xbf16, #tpu.memory_space<vmem>>, vector<1x32x32xbf16>
    %81 = vector.shape_cast %80 : vector<1x32x32xbf16> to vector<32x32xbf16>
    %82 = arith.truncf %79 : vector<16x32xf32> to vector<16x32xbf16>
    %cst_32 = arith.constant dense<0.000000e+00> : vector<16x32xf32>
    %83 = tpu.matmul %82, %81, %cst_32 {dimension_numbers = #tpu.dot_dimension_numbers<[1], [0], [0], [1], [0, 0, 1, 1], [], []>} : vector<16x32xbf16>, vector<32x32xbf16>, vector<16x32xf32> -> vector<16x32xf32>
    %c0_33 = arith.constant 0 : index
    %c0_34 = arith.constant 0 : index
    %c0_35 = arith.constant 0 : index
    %84 = vector.load %arg8[%c0_33, %c0_34, %c0_35] : memref<2x1x32xf32, #tpu.memory_space<vmem>>, vector<1x1x32xf32>
    %85 = vector.shape_cast %84 : vector<1x1x32xf32> to vector<1x32xf32>
    %86 = vector.broadcast %85 : vector<1x32xf32> to vector<16x32xf32>
    %87 = arith.addf %83, %86 : vector<16x32xf32>
    %88 = arith.addf %87, %25 : vector<16x32xf32>
    %c0_36 = arith.constant 0 : index
    %c0_37 = arith.constant 0 : index
    %c0_38 = arith.constant 0 : index
    %89 = vector.load %arg9[%c0_36, %c0_37, %c0_38] : memref<2x1x32xf32, #tpu.memory_space<vmem>>, vector<1x1x32xf32>
    %90 = vector.shape_cast %89 : vector<1x1x32xf32> to vector<1x32xf32>
    %c0_39 = arith.constant 0 : index
    %c0_40 = arith.constant 0 : index
    %c0_41 = arith.constant 0 : index
    %91 = vector.load %arg10[%c0_39, %c0_40, %c0_41] : memref<2x1x32xf32, #tpu.memory_space<vmem>>, vector<1x1x32xf32>
    %92 = vector.shape_cast %91 : vector<1x1x32xf32> to vector<1x32xf32>
    %cst_42 = arith.constant dense<0.000000e+00> : vector<16xf32>
    %93 = vector.multi_reduction <add>, %88, %cst_42 [1] : vector<16x32xf32> to vector<16xf32>
    %94 = vector.shape_cast %93 : vector<16xf32> to vector<16x1xf32>
    %cst_43 = arith.constant 3.200000e+01 : f32
    %95 = vector.broadcast %cst_43 : f32 to vector<16x1xf32>
    %96 = arith.divf %94, %95 : vector<16x1xf32>
    %97 = vector.broadcast %96 : vector<16x1xf32> to vector<16x32xf32>
    %98 = arith.subf %88, %97 : vector<16x32xf32>
    %99 = arith.mulf %98, %98 : vector<16x32xf32>
    %cst_44 = arith.constant dense<0.000000e+00> : vector<16xf32>
    %100 = vector.multi_reduction <add>, %99, %cst_44 [1] : vector<16x32xf32> to vector<16xf32>
    %101 = vector.shape_cast %100 : vector<16xf32> to vector<16x1xf32>
    %cst_45 = arith.constant 3.200000e+01 : f32
    %102 = vector.broadcast %cst_45 : f32 to vector<16x1xf32>
    %103 = arith.divf %101, %102 : vector<16x1xf32>
    %cst_46 = arith.constant 9.99999996E-13 : f32
    %104 = vector.broadcast %cst_46 : f32 to vector<16x1xf32>
    %105 = arith.addf %103, %104 : vector<16x1xf32>
    %106 = math.rsqrt %105 : vector<16x1xf32>
    %107 = vector.broadcast %106 : vector<16x1xf32> to vector<16x32xf32>
    %108 = arith.mulf %98, %107 : vector<16x32xf32>
    %109 = vector.broadcast %90 : vector<1x32xf32> to vector<16x32xf32>
    %110 = arith.mulf %108, %109 : vector<16x32xf32>
    %111 = vector.broadcast %92 : vector<1x32xf32> to vector<16x32xf32>
    %112 = arith.addf %110, %111 : vector<16x32xf32>
    %c0_47 = arith.constant 0 : index
    %c0_48 = arith.constant 0 : index
    %c0_49 = arith.constant 0 : index
    %113 = vector.load %arg11[%c0_47, %c0_48, %c0_49] : memref<2x32x64xbf16, #tpu.memory_space<vmem>>, vector<1x32x64xbf16>
    %114 = vector.shape_cast %113 : vector<1x32x64xbf16> to vector<32x64xbf16>
    %115 = arith.truncf %112 : vector<16x32xf32> to vector<16x32xbf16>
    %cst_50 = arith.constant dense<0.000000e+00> : vector<16x64xf32>
    %116 = tpu.matmul %115, %114, %cst_50 {dimension_numbers = #tpu.dot_dimension_numbers<[1], [0], [0], [1], [0, 0, 1, 1], [], []>} : vector<16x32xbf16>, vector<32x64xbf16>, vector<16x64xf32> -> vector<16x64xf32>
    %c0_51 = arith.constant 0 : index
    %c0_52 = arith.constant 0 : index
    %c0_53 = arith.constant 0 : index
    %117 = vector.load %arg12[%c0_51, %c0_52, %c0_53] : memref<2x1x64xf32, #tpu.memory_space<vmem>>, vector<1x1x64xf32>
    %118 = vector.shape_cast %117 : vector<1x1x64xf32> to vector<1x64xf32>
    %119 = vector.broadcast %118 : vector<1x64xf32> to vector<16x64xf32>
    %120 = arith.addf %116, %119 : vector<16x64xf32>
    %cst_54 = arith.constant 5.000000e-01 : f32
    %121 = vector.broadcast %cst_54 : f32 to vector<16x64xf32>
    %122 = arith.mulf %121, %120 : vector<16x64xf32>
    %cst_55 = arith.constant 4.471500e-02 : f32
    %123 = vector.broadcast %cst_55 : f32 to vector<16x64xf32>
    %124 = arith.mulf %123, %120 : vector<16x64xf32>
    %125 = arith.mulf %124, %120 : vector<16x64xf32>
    %126 = arith.mulf %125, %120 : vector<16x64xf32>
    %127 = arith.addf %120, %126 : vector<16x64xf32>
    %cst_56 = arith.constant 0.797884583 : f32
    %128 = vector.broadcast %cst_56 : f32 to vector<16x64xf32>
    %129 = arith.mulf %128, %127 : vector<16x64xf32>
    %130 = math.tanh %129 : vector<16x64xf32>
    %cst_57 = arith.constant 1.000000e+00 : f32
    %131 = vector.broadcast %cst_57 : f32 to vector<16x64xf32>
    %132 = arith.addf %131, %130 : vector<16x64xf32>
    %133 = arith.mulf %122, %132 : vector<16x64xf32>
    %c0_58 = arith.constant 0 : index
    %c0_59 = arith.constant 0 : index
    %c0_60 = arith.constant 0 : index
    %134 = vector.load %arg13[%c0_58, %c0_59, %c0_60] : memref<2x64x32xbf16, #tpu.memory_space<vmem>>, vector<1x64x32xbf16>
    %135 = vector.shape_cast %134 : vector<1x64x32xbf16> to vector<64x32xbf16>
    %136 = arith.truncf %133 : vector<16x64xf32> to vector<16x64xbf16>
    %cst_61 = arith.constant dense<0.000000e+00> : vector<16x32xf32>
    %137 = tpu.matmul %136, %135, %cst_61 {dimension_numbers = #tpu.dot_dimension_numbers<[1], [0], [0], [1], [0, 0, 1, 1], [], []>} : vector<16x64xbf16>, vector<64x32xbf16>, vector<16x32xf32> -> vector<16x32xf32>
    %c0_62 = arith.constant 0 : index
    %c0_63 = arith.constant 0 : index
    %c0_64 = arith.constant 0 : index
    %138 = vector.load %arg14[%c0_62, %c0_63, %c0_64] : memref<2x1x32xf32, #tpu.memory_space<vmem>>, vector<1x1x32xf32>
    %139 = vector.shape_cast %138 : vector<1x1x32xf32> to vector<1x32xf32>
    %140 = vector.broadcast %139 : vector<1x32xf32> to vector<16x32xf32>
    %141 = arith.addf %137, %140 : vector<16x32xf32>
    %142 = arith.addf %141, %112 : vector<16x32xf32>
    %c0_65 = arith.constant 0 : index
    %c0_66 = arith.constant 0 : index
    %c0_67 = arith.constant 0 : index
    %143 = vector.load %arg15[%c0_65, %c0_66, %c0_67] : memref<2x1x32xf32, #tpu.memory_space<vmem>>, vector<1x1x32xf32>
    %144 = vector.shape_cast %143 : vector<1x1x32xf32> to vector<1x32xf32>
    %c0_68 = arith.constant 0 : index
    %c0_69 = arith.constant 0 : index
    %c0_70 = arith.constant 0 : index
    %145 = vector.load %arg16[%c0_68, %c0_69, %c0_70] : memref<2x1x32xf32, #tpu.memory_space<vmem>>, vector<1x1x32xf32>
    %146 = vector.shape_cast %145 : vector<1x1x32xf32> to vector<1x32xf32>
    %cst_71 = arith.constant dense<0.000000e+00> : vector<16xf32>
    %147 = vector.multi_reduction <add>, %142, %cst_71 [1] : vector<16x32xf32> to vector<16xf32>
    %148 = vector.shape_cast %147 : vector<16xf32> to vector<16x1xf32>
    %cst_72 = arith.constant 3.200000e+01 : f32
    %149 = vector.broadcast %cst_72 : f32 to vector<16x1xf32>
    %150 = arith.divf %148, %149 : vector<16x1xf32>
    %151 = vector.broadcast %150 : vector<16x1xf32> to vector<16x32xf32>
    %152 = arith.subf %142, %151 : vector<16x32xf32>
    %153 = arith.mulf %152, %152 : vector<16x32xf32>
    %cst_73 = arith.constant dense<0.000000e+00> : vector<16xf32>
    %154 = vector.multi_reduction <add>, %153, %cst_73 [1] : vector<16x32xf32> to vector<16xf32>
    %155 = vector.shape_cast %154 : vector<16xf32> to vector<16x1xf32>
    %cst_74 = arith.constant 3.200000e+01 : f32
    %156 = vector.broadcast %cst_74 : f32 to vector<16x1xf32>
    %157 = arith.divf %155, %156 : vector<16x1xf32>
    %cst_75 = arith.constant 9.99999996E-13 : f32
    %158 = vector.broadcast %cst_75 : f32 to vector<16x1xf32>
    %159 = arith.addf %157, %158 : vector<16x1xf32>
    %160 = math.rsqrt %159 : vector<16x1xf32>
    %161 = vector.broadcast %160 : vector<16x1xf32> to vector<16x32xf32>
    %162 = arith.mulf %152, %161 : vector<16x32xf32>
    %163 = vector.broadcast %144 : vector<1x32xf32> to vector<16x32xf32>
    %164 = arith.mulf %162, %163 : vector<16x32xf32>
    %165 = vector.broadcast %146 : vector<1x32xf32> to vector<16x32xf32>
    %166 = arith.addf %164, %165 : vector<16x32xf32>
    %c1 = arith.constant 1 : index
    %c0_76 = arith.constant 0 : index
    %c0_77 = arith.constant 0 : index
    %167 = vector.load %arg5[%c1, %c0_76, %c0_77] : memref<2x32x96xbf16, #tpu.memory_space<vmem>>, vector<1x32x96xbf16>
    %168 = vector.shape_cast %167 : vector<1x32x96xbf16> to vector<32x96xbf16>
    %169 = arith.truncf %166 : vector<16x32xf32> to vector<16x32xbf16>
    %cst_78 = arith.constant dense<0.000000e+00> : vector<16x96xf32>
    %170 = tpu.matmul %169, %168, %cst_78 {dimension_numbers = #tpu.dot_dimension_numbers<[1], [0], [0], [1], [0, 0, 1, 1], [], []>} : vector<16x32xbf16>, vector<32x96xbf16>, vector<16x96xf32> -> vector<16x96xf32>
    %c1_79 = arith.constant 1 : index
    %c0_80 = arith.constant 0 : index
    %c0_81 = arith.constant 0 : index
    %171 = vector.load %arg6[%c1_79, %c0_80, %c0_81] : memref<2x1x96xf32, #tpu.memory_space<vmem>>, vector<1x1x96xf32>
    %172 = vector.shape_cast %171 : vector<1x1x96xf32> to vector<1x96xf32>
    %173 = vector.broadcast %172 : vector<1x96xf32> to vector<16x96xf32>
    %174 = arith.addf %170, %173 : vector<16x96xf32>
    %175 = vector.extract_strided_slice %174 {offsets = [0, 0], sizes = [16, 32], strides = [1, 1]} : vector<16x96xf32> to vector<16x32xf32>
    %cst_82 = arith.constant 2.500000e-01 : f32
    %176 = vector.broadcast %cst_82 : f32 to vector<16x32xf32>
    %177 = arith.mulf %175, %176 : vector<16x32xf32>
    %178 = vector.extract_strided_slice %174 {offsets = [0, 32], sizes = [16, 32], strides = [1, 1]} : vector<16x96xf32> to vector<16x32xf32>
    %179 = vector.extract_strided_slice %174 {offsets = [0, 64], sizes = [16, 32], strides = [1, 1]} : vector<16x96xf32> to vector<16x32xf32>
    %180 = vector.extract_strided_slice %177 {offsets = [0, 0], sizes = [16, 16], strides = [1, 1]} : vector<16x32xf32> to vector<16x16xf32>
    %181 = vector.extract_strided_slice %178 {offsets = [0, 0], sizes = [16, 16], strides = [1, 1]} : vector<16x32xf32> to vector<16x16xf32>
    %182 = arith.truncf %180 : vector<16x16xf32> to vector<16x16xbf16>
    %183 = arith.truncf %181 : vector<16x16xf32> to vector<16x16xbf16>
    %cst_83 = arith.constant dense<0.000000e+00> : vector<16x16xf32>
    %184 = tpu.matmul %182, %183, %cst_83 {dimension_numbers = #tpu.dot_dimension_numbers<[1], [1], [0], [0], [0, 0, 1, 0], [], []>} : vector<16x16xbf16>, vector<16x16xbf16>, vector<16x16xf32> -> vector<16x16xf32>
    %185 = arith.addf %184, %3 : vector<16x16xf32>
    %cst_84 = arith.constant dense<0xFF800000> : vector<16xf32>
    %186 = vector.multi_reduction <maximumf>, %185, %cst_84 [1] : vector<16x16xf32> to vector<16xf32>
    %187 = vector.shape_cast %186 : vector<16xf32> to vector<16x1xf32>
    %188 = vector.broadcast %187 : vector<16x1xf32> to vector<16x16xf32>
    %189 = arith.subf %185, %188 : vector<16x16xf32>
    %190 = math.exp %189 : vector<16x16xf32>
    %cst_85 = arith.constant dense<0.000000e+00> : vector<16xf32>
    %191 = vector.multi_reduction <add>, %190, %cst_85 [1] : vector<16x16xf32> to vector<16xf32>
    %192 = vector.shape_cast %191 : vector<16xf32> to vector<16x1xf32>
    %193 = tpu.reciprocal %192 {approx = true} : vector<16x1xf32> -> vector<16x1xf32>
    %194 = vector.broadcast %193 : vector<16x1xf32> to vector<16x16xf32>
    %195 = arith.mulf %190, %194 : vector<16x16xf32>
    %196 = vector.extract_strided_slice %179 {offsets = [0, 0], sizes = [16, 16], strides = [1, 1]} : vector<16x32xf32> to vector<16x16xf32>
    %197 = arith.truncf %195 : vector<16x16xf32> to vector<16x16xbf16>
    %198 = arith.truncf %196 : vector<16x16xf32> to vector<16x16xbf16>
    %cst_86 = arith.constant dense<0.000000e+00> : vector<16x16xf32>
    %199 = tpu.matmul %197, %198, %cst_86 {dimension_numbers = #tpu.dot_dimension_numbers<[1], [0], [0], [1], [0, 0, 1, 1], [], []>} : vector<16x16xbf16>, vector<16x16xbf16>, vector<16x16xf32> -> vector<16x16xf32>
    %200 = vector.extract_strided_slice %177 {offsets = [0, 16], sizes = [16, 16], strides = [1, 1]} : vector<16x32xf32> to vector<16x16xf32>
    %201 = vector.extract_strided_slice %178 {offsets = [0, 16], sizes = [16, 16], strides = [1, 1]} : vector<16x32xf32> to vector<16x16xf32>
    %202 = arith.truncf %200 : vector<16x16xf32> to vector<16x16xbf16>
    %203 = arith.truncf %201 : vector<16x16xf32> to vector<16x16xbf16>
    %cst_87 = arith.constant dense<0.000000e+00> : vector<16x16xf32>
    %204 = tpu.matmul %202, %203, %cst_87 {dimension_numbers = #tpu.dot_dimension_numbers<[1], [1], [0], [0], [0, 0, 1, 0], [], []>} : vector<16x16xbf16>, vector<16x16xbf16>, vector<16x16xf32> -> vector<16x16xf32>
    %205 = arith.addf %204, %3 : vector<16x16xf32>
    %cst_88 = arith.constant dense<0xFF800000> : vector<16xf32>
    %206 = vector.multi_reduction <maximumf>, %205, %cst_88 [1] : vector<16x16xf32> to vector<16xf32>
    %207 = vector.shape_cast %206 : vector<16xf32> to vector<16x1xf32>
    %208 = vector.broadcast %207 : vector<16x1xf32> to vector<16x16xf32>
    %209 = arith.subf %205, %208 : vector<16x16xf32>
    %210 = math.exp %209 : vector<16x16xf32>
    %cst_89 = arith.constant dense<0.000000e+00> : vector<16xf32>
    %211 = vector.multi_reduction <add>, %210, %cst_89 [1] : vector<16x16xf32> to vector<16xf32>
    %212 = vector.shape_cast %211 : vector<16xf32> to vector<16x1xf32>
    %213 = tpu.reciprocal %212 {approx = true} : vector<16x1xf32> -> vector<16x1xf32>
    %214 = vector.broadcast %213 : vector<16x1xf32> to vector<16x16xf32>
    %215 = arith.mulf %210, %214 : vector<16x16xf32>
    %216 = vector.extract_strided_slice %179 {offsets = [0, 16], sizes = [16, 16], strides = [1, 1]} : vector<16x32xf32> to vector<16x16xf32>
    %217 = arith.truncf %215 : vector<16x16xf32> to vector<16x16xbf16>
    %218 = arith.truncf %216 : vector<16x16xf32> to vector<16x16xbf16>
    %cst_90 = arith.constant dense<0.000000e+00> : vector<16x16xf32>
    %219 = tpu.matmul %217, %218, %cst_90 {dimension_numbers = #tpu.dot_dimension_numbers<[1], [0], [0], [1], [0, 0, 1, 1], [], []>} : vector<16x16xbf16>, vector<16x16xbf16>, vector<16x16xf32> -> vector<16x16xf32>
    %220 = tpu.concatenate %199, %219 in 1 : vector<16x16xf32>, vector<16x16xf32> -> vector<16x32xf32>
    %c1_91 = arith.constant 1 : index
    %c0_92 = arith.constant 0 : index
    %c0_93 = arith.constant 0 : index
    %221 = vector.load %arg7[%c1_91, %c0_92, %c0_93] : memref<2x32x32xbf16, #tpu.memory_space<vmem>>, vector<1x32x32xbf16>
    %222 = vector.shape_cast %221 : vector<1x32x32xbf16> to vector<32x32xbf16>
    %223 = arith.truncf %220 : vector<16x32xf32> to vector<16x32xbf16>
    %cst_94 = arith.constant dense<0.000000e+00> : vector<16x32xf32>
    %224 = tpu.matmul %223, %222, %cst_94 {dimension_numbers = #tpu.dot_dimension_numbers<[1], [0], [0], [1], [0, 0, 1, 1], [], []>} : vector<16x32xbf16>, vector<32x32xbf16>, vector<16x32xf32> -> vector<16x32xf32>
    %c1_95 = arith.constant 1 : index
    %c0_96 = arith.constant 0 : index
    %c0_97 = arith.constant 0 : index
    %225 = vector.load %arg8[%c1_95, %c0_96, %c0_97] : memref<2x1x32xf32, #tpu.memory_space<vmem>>, vector<1x1x32xf32>
    %226 = vector.shape_cast %225 : vector<1x1x32xf32> to vector<1x32xf32>
    %227 = vector.broadcast %226 : vector<1x32xf32> to vector<16x32xf32>
    %228 = arith.addf %224, %227 : vector<16x32xf32>
    %229 = arith.addf %228, %166 : vector<16x32xf32>
    %c1_98 = arith.constant 1 : index
    %c0_99 = arith.constant 0 : index
    %c0_100 = arith.constant 0 : index
    %230 = vector.load %arg9[%c1_98, %c0_99, %c0_100] : memref<2x1x32xf32, #tpu.memory_space<vmem>>, vector<1x1x32xf32>
    %231 = vector.shape_cast %230 : vector<1x1x32xf32> to vector<1x32xf32>
    %c1_101 = arith.constant 1 : index
    %c0_102 = arith.constant 0 : index
    %c0_103 = arith.constant 0 : index
    %232 = vector.load %arg10[%c1_101, %c0_102, %c0_103] : memref<2x1x32xf32, #tpu.memory_space<vmem>>, vector<1x1x32xf32>
    %233 = vector.shape_cast %232 : vector<1x1x32xf32> to vector<1x32xf32>
    %cst_104 = arith.constant dense<0.000000e+00> : vector<16xf32>
    %234 = vector.multi_reduction <add>, %229, %cst_104 [1] : vector<16x32xf32> to vector<16xf32>
    %235 = vector.shape_cast %234 : vector<16xf32> to vector<16x1xf32>
    %cst_105 = arith.constant 3.200000e+01 : f32
    %236 = vector.broadcast %cst_105 : f32 to vector<16x1xf32>
    %237 = arith.divf %235, %236 : vector<16x1xf32>
    %238 = vector.broadcast %237 : vector<16x1xf32> to vector<16x32xf32>
    %239 = arith.subf %229, %238 : vector<16x32xf32>
    %240 = arith.mulf %239, %239 : vector<16x32xf32>
    %cst_106 = arith.constant dense<0.000000e+00> : vector<16xf32>
    %241 = vector.multi_reduction <add>, %240, %cst_106 [1] : vector<16x32xf32> to vector<16xf32>
    %242 = vector.shape_cast %241 : vector<16xf32> to vector<16x1xf32>
    %cst_107 = arith.constant 3.200000e+01 : f32
    %243 = vector.broadcast %cst_107 : f32 to vector<16x1xf32>
    %244 = arith.divf %242, %243 : vector<16x1xf32>
    %cst_108 = arith.constant 9.99999996E-13 : f32
    %245 = vector.broadcast %cst_108 : f32 to vector<16x1xf32>
    %246 = arith.addf %244, %245 : vector<16x1xf32>
    %247 = math.rsqrt %246 : vector<16x1xf32>
    %248 = vector.broadcast %247 : vector<16x1xf32> to vector<16x32xf32>
    %249 = arith.mulf %239, %248 : vector<16x32xf32>
    %250 = vector.broadcast %231 : vector<1x32xf32> to vector<16x32xf32>
    %251 = arith.mulf %249, %250 : vector<16x32xf32>
    %252 = vector.broadcast %233 : vector<1x32xf32> to vector<16x32xf32>
    %253 = arith.addf %251, %252 : vector<16x32xf32>
    %c1_109 = arith.constant 1 : index
    %c0_110 = arith.constant 0 : index
    %c0_111 = arith.constant 0 : index
    %254 = vector.load %arg11[%c1_109, %c0_110, %c0_111] : memref<2x32x64xbf16, #tpu.memory_space<vmem>>, vector<1x32x64xbf16>
    %255 = vector.shape_cast %254 : vector<1x32x64xbf16> to vector<32x64xbf16>
    %256 = arith.truncf %253 : vector<16x32xf32> to vector<16x32xbf16>
    %cst_112 = arith.constant dense<0.000000e+00> : vector<16x64xf32>
    %257 = tpu.matmul %256, %255, %cst_112 {dimension_numbers = #tpu.dot_dimension_numbers<[1], [0], [0], [1], [0, 0, 1, 1], [], []>} : vector<16x32xbf16>, vector<32x64xbf16>, vector<16x64xf32> -> vector<16x64xf32>
    %c1_113 = arith.constant 1 : index
    %c0_114 = arith.constant 0 : index
    %c0_115 = arith.constant 0 : index
    %258 = vector.load %arg12[%c1_113, %c0_114, %c0_115] : memref<2x1x64xf32, #tpu.memory_space<vmem>>, vector<1x1x64xf32>
    %259 = vector.shape_cast %258 : vector<1x1x64xf32> to vector<1x64xf32>
    %260 = vector.broadcast %259 : vector<1x64xf32> to vector<16x64xf32>
    %261 = arith.addf %257, %260 : vector<16x64xf32>
    %cst_116 = arith.constant 5.000000e-01 : f32
    %262 = vector.broadcast %cst_116 : f32 to vector<16x64xf32>
    %263 = arith.mulf %262, %261 : vector<16x64xf32>
    %cst_117 = arith.constant 4.471500e-02 : f32
    %264 = vector.broadcast %cst_117 : f32 to vector<16x64xf32>
    %265 = arith.mulf %264, %261 : vector<16x64xf32>
    %266 = arith.mulf %265, %261 : vector<16x64xf32>
    %267 = arith.mulf %266, %261 : vector<16x64xf32>
    %268 = arith.addf %261, %267 : vector<16x64xf32>
    %cst_118 = arith.constant 0.797884583 : f32
    %269 = vector.broadcast %cst_118 : f32 to vector<16x64xf32>
    %270 = arith.mulf %269, %268 : vector<16x64xf32>
    %271 = math.tanh %270 : vector<16x64xf32>
    %cst_119 = arith.constant 1.000000e+00 : f32
    %272 = vector.broadcast %cst_119 : f32 to vector<16x64xf32>
    %273 = arith.addf %272, %271 : vector<16x64xf32>
    %274 = arith.mulf %263, %273 : vector<16x64xf32>
    %c1_120 = arith.constant 1 : index
    %c0_121 = arith.constant 0 : index
    %c0_122 = arith.constant 0 : index
    %275 = vector.load %arg13[%c1_120, %c0_121, %c0_122] : memref<2x64x32xbf16, #tpu.memory_space<vmem>>, vector<1x64x32xbf16>
    %276 = vector.shape_cast %275 : vector<1x64x32xbf16> to vector<64x32xbf16>
    %277 = arith.truncf %274 : vector<16x64xf32> to vector<16x64xbf16>
    %cst_123 = arith.constant dense<0.000000e+00> : vector<16x32xf32>
    %278 = tpu.matmul %277, %276, %cst_123 {dimension_numbers = #tpu.dot_dimension_numbers<[1], [0], [0], [1], [0, 0, 1, 1], [], []>} : vector<16x64xbf16>, vector<64x32xbf16>, vector<16x32xf32> -> vector<16x32xf32>
    %c1_124 = arith.constant 1 : index
    %c0_125 = arith.constant 0 : index
    %c0_126 = arith.constant 0 : index
    %279 = vector.load %arg14[%c1_124, %c0_125, %c0_126] : memref<2x1x32xf32, #tpu.memory_space<vmem>>, vector<1x1x32xf32>
    %280 = vector.shape_cast %279 : vector<1x1x32xf32> to vector<1x32xf32>
    %281 = vector.broadcast %280 : vector<1x32xf32> to vector<16x32xf32>
    %282 = arith.addf %278, %281 : vector<16x32xf32>
    %283 = arith.addf %282, %253 : vector<16x32xf32>
    %c1_127 = arith.constant 1 : index
    %c0_128 = arith.constant 0 : index
    %c0_129 = arith.constant 0 : index
    %284 = vector.load %arg15[%c1_127, %c0_128, %c0_129] : memref<2x1x32xf32, #tpu.memory_space<vmem>>, vector<1x1x32xf32>
    %285 = vector.shape_cast %284 : vector<1x1x32xf32> to vector<1x32xf32>
    %c1_130 = arith.constant 1 : index
    %c0_131 = arith.constant 0 : index
    %c0_132 = arith.constant 0 : index
    %286 = vector.load %arg16[%c1_130, %c0_131, %c0_132] : memref<2x1x32xf32, #tpu.memory_space<vmem>>, vector<1x1x32xf32>
    %287 = vector.shape_cast %286 : vector<1x1x32xf32> to vector<1x32xf32>
    %cst_133 = arith.constant dense<0.000000e+00> : vector<16xf32>
    %288 = vector.multi_reduction <add>, %283, %cst_133 [1] : vector<16x32xf32> to vector<16xf32>
    %289 = vector.shape_cast %288 : vector<16xf32> to vector<16x1xf32>
    %cst_134 = arith.constant 3.200000e+01 : f32
    %290 = vector.broadcast %cst_134 : f32 to vector<16x1xf32>
    %291 = arith.divf %289, %290 : vector<16x1xf32>
    %292 = vector.broadcast %291 : vector<16x1xf32> to vector<16x32xf32>
    %293 = arith.subf %283, %292 : vector<16x32xf32>
    %294 = arith.mulf %293, %293 : vector<16x32xf32>
    %cst_135 = arith.constant dense<0.000000e+00> : vector<16xf32>
    %295 = vector.multi_reduction <add>, %294, %cst_135 [1] : vector<16x32xf32> to vector<16xf32>
    %296 = vector.shape_cast %295 : vector<16xf32> to vector<16x1xf32>
    %cst_136 = arith.constant 3.200000e+01 : f32
    %297 = vector.broadcast %cst_136 : f32 to vector<16x1xf32>
    %298 = arith.divf %296, %297 : vector<16x1xf32>
    %cst_137 = arith.constant 9.99999996E-13 : f32
    %299 = vector.broadcast %cst_137 : f32 to vector<16x1xf32>
    %300 = arith.addf %298, %299 : vector<16x1xf32>
    %301 = math.rsqrt %300 : vector<16x1xf32>
    %302 = vector.broadcast %301 : vector<16x1xf32> to vector<16x32xf32>
    %303 = arith.mulf %293, %302 : vector<16x32xf32>
    %304 = vector.broadcast %285 : vector<1x32xf32> to vector<16x32xf32>
    %305 = arith.mulf %303, %304 : vector<16x32xf32>
    %306 = vector.broadcast %287 : vector<1x32xf32> to vector<16x32xf32>
    %307 = arith.addf %305, %306 : vector<16x32xf32>
    %308 = vector.extract_strided_slice %307 {offsets = [0, 0], sizes = [1, 32], strides = [1, 1]} : vector<16x32xf32> to vector<1x32xf32>
    %309 = vector.extract_strided_slice %307 {offsets = [8, 0], sizes = [1, 32], strides = [1, 1]} : vector<16x32xf32> to vector<1x32xf32>
    %310 = tpu.concatenate %308, %309 in 0 : vector<1x32xf32>, vector<1x32xf32> -> vector<2x32xf32>
    %c0_138 = arith.constant 0 : index
    %c0_139 = arith.constant 0 : index
    %311 = vector.load %arg17[%c0_138, %c0_139] : memref<1x32xf32, #tpu.memory_space<vmem>>, vector<1x32xf32>
    %312 = vector.broadcast %311 : vector<1x32xf32> to vector<2x32xf32>
    %313 = arith.mulf %310, %312 : vector<2x32xf32>
    %cst_140 = arith.constant dense<0.000000e+00> : vector<2xf32>
    %314 = vector.multi_reduction <add>, %313, %cst_140 [1] : vector<2x32xf32> to vector<2xf32>
    %315 = vector.shape_cast %314 : vector<2xf32> to vector<2x1xf32>
    %c0_141 = arith.constant 0 : index
    %c0_142 = arith.constant 0 : index
    %c0_143 = arith.constant 0 : index
    %316 = vector.load %arg18[%c0_141, %c0_142, %c0_143] : memref<1x2x1xf32, #tpu.memory_space<vmem>>, vector<1x2x1xf32>
    %317 = vector.shape_cast %316 : vector<1x2x1xf32> to vector<2x1xf32>
    %318 = vector.shape_cast %315 : vector<2x1xf32> to vector<1x2x1xf32>
    tpu.vector_store %arg18[%c0_141, %c0_142, %c0_143], %318 {strides = array<i32>} : memref<1x2x1xf32, #tpu.memory_space<vmem>>, vector<1x2x1xf32>,
    return
  }
  func.func @transform_0(%arg0: i32) -> (i32, i32, i32) {
    %c0_i32 = arith.constant 0 : i32
    %c0_i32_0 = arith.constant 0 : i32
    %c0_i32_1 = arith.constant 0 : i32
    return %arg0, %c0_i32, %c0_i32_0 : i32, i32, i32
  }
  func.func @transform_1(%arg0: i32) -> (i32, i32, i32) {
    %c0_i32 = arith.constant 0 : i32
    %c0_i32_0 = arith.constant 0 : i32
    %c0_i32_1 = arith.constant 0 : i32
    return %arg0, %c0_i32, %c0_i32_0 : i32, i32, i32
  }
  func.func @transform_2(%arg0: i32) -> (i32, i32) {
    %c0_i32 = arith.constant 0 : i32
    %c0_i32_0 = arith.constant 0 : i32
    %c0_i32_1 = arith.constant 0 : i32
    return %c0_i32, %c0_i32_0 : i32, i32
  }
  func.func @transform_3(%arg0: i32) -> (i32, i32) {
    %c0_i32 = arith.constant 0 : i32
    %c0_i32_0 = arith.constant 0 : i32
    %c0_i32_1 = arith.constant 0 : i32
    return %c0_i32, %c0_i32_0 : i32, i32
  }
  func.func @transform_4(%arg0: i32) -> (i32, i32, i32) {
    %c0_i32 = arith.constant 0 : i32
    %c0_i32_0 = arith.constant 0 : i32
    %c0_i32_1 = arith.constant 0 : i32
    %c0_i32_2 = arith.constant 0 : i32
    return %c0_i32, %c0_i32_0, %c0_i32_1 : i32, i32, i32
  }
  func.func @transform_5(%arg0: i32) -> (i32, i32, i32) {
    %c0_i32 = arith.constant 0 : i32
    %c0_i32_0 = arith.constant 0 : i32
    %c0_i32_1 = arith.constant 0 : i32
    %c0_i32_2 = arith.constant 0 : i32
    return %c0_i32, %c0_i32_0, %c0_i32_1 : i32, i32, i32
  }
  func.func @transform_6(%arg0: i32) -> (i32, i32, i32) {
    %c0_i32 = arith.constant 0 : i32
    %c0_i32_0 = arith.constant 0 : i32
    %c0_i32_1 = arith.constant 0 : i32
    %c0_i32_2 = arith.constant 0 : i32
    return %c0_i32, %c0_i32_0, %c0_i32_1 : i32, i32, i32
  }
  func.func @transform_7(%arg0: i32) -> (i32, i32, i32) {
    %c0_i32 = arith.constant 0 : i32
    %c0_i32_0 = arith.constant 0 : i32
    %c0_i32_1 = arith.constant 0 : i32
    %c0_i32_2 = arith.constant 0 : i32
    return %c0_i32, %c0_i32_0, %c0_i32_1 : i32, i32, i32
  }
  func.func @transform_8(%arg0: i32) -> (i32, i32, i32) {
    %c0_i32 = arith.constant 0 : i32
    %c0_i32_0 = arith.constant 0 : i32
    %c0_i32_1 = arith.constant 0 : i32
    %c0_i32_2 = arith.constant 0 : i32
    return %c0_i32, %c0_i32_0, %c0_i32_1 : i32, i32, i32
  }
  func.func @transform_9(%arg0: i32) -> (i32, i32, i32) {
    %c0_i32 = arith.constant 0 : i32
    %c0_i32_0 = arith.constant 0 : i32
    %c0_i32_1 = arith.constant 0 : i32
    %c0_i32_2 = arith.constant 0 : i32
    return %c0_i32, %c0_i32_0, %c0_i32_1 : i32, i32, i32
  }
  func.func @transform_10(%arg0: i32) -> (i32, i32, i32) {
    %c0_i32 = arith.constant 0 : i32
    %c0_i32_0 = arith.constant 0 : i32
    %c0_i32_1 = arith.constant 0 : i32
    %c0_i32_2 = arith.constant 0 : i32
    return %c0_i32, %c0_i32_0, %c0_i32_1 : i32, i32, i32
  }
  func.func @transform_11(%arg0: i32) -> (i32, i32, i32) {
    %c0_i32 = arith.constant 0 : i32
    %c0_i32_0 = arith.constant 0 : i32
    %c0_i32_1 = arith.constant 0 : i32
    %c0_i32_2 = arith.constant 0 : i32
    return %c0_i32, %c0_i32_0, %c0_i32_1 : i32, i32, i32
  }
  func.func @transform_12(%arg0: i32) -> (i32, i32, i32) {
    %c0_i32 = arith.constant 0 : i32
    %c0_i32_0 = arith.constant 0 : i32
    %c0_i32_1 = arith.constant 0 : i32
    %c0_i32_2 = arith.constant 0 : i32
    return %c0_i32, %c0_i32_0, %c0_i32_1 : i32, i32, i32
  }
  func.func @transform_13(%arg0: i32) -> (i32, i32, i32) {
    %c0_i32 = arith.constant 0 : i32
    %c0_i32_0 = arith.constant 0 : i32
    %c0_i32_1 = arith.constant 0 : i32
    %c0_i32_2 = arith.constant 0 : i32
    return %c0_i32, %c0_i32_0, %c0_i32_1 : i32, i32, i32
  }
  func.func @transform_14(%arg0: i32) -> (i32, i32, i32) {
    %c0_i32 = arith.constant 0 : i32
    %c0_i32_0 = arith.constant 0 : i32
    %c0_i32_1 = arith.constant 0 : i32
    %c0_i32_2 = arith.constant 0 : i32
    return %c0_i32, %c0_i32_0, %c0_i32_1 : i32, i32, i32
  }
  func.func @transform_15(%arg0: i32) -> (i32, i32, i32) {
    %c0_i32 = arith.constant 0 : i32
    %c0_i32_0 = arith.constant 0 : i32
    %c0_i32_1 = arith.constant 0 : i32
    %c0_i32_2 = arith.constant 0 : i32
    return %c0_i32, %c0_i32_0, %c0_i32_1 : i32, i32, i32
  }
  func.func @transform_16(%arg0: i32) -> (i32, i32) {
    %c0_i32 = arith.constant 0 : i32
    %c0_i32_0 = arith.constant 0 : i32
    %c0_i32_1 = arith.constant 0 : i32
    return %c0_i32, %c0_i32_0 : i32, i32
  }
  func.func @transform_17(%arg0: i32) -> (i32, i32, i32) {
    %c0_i32 = arith.constant 0 : i32
    %c0_i32_0 = arith.constant 0 : i32
    %c0_i32_1 = arith.constant 0 : i32
    return %arg0, %c0_i32, %c0_i32_0 : i32, i32, i32
  }
}

</mosaic_0001>

<bundles_post_ra>
// kernel: bert_binary_classifier_forward.1
= control target key start
LH: loop header
LB: loop body
LE: loop exit
PB: predicated region body
PF: predicated region fallthrough
CT: control target
= control target key end

     0   :  { %s2497_s24 = smov 0   ;;  %s2814_s0 = inlined_call_operand.vmem [shape: f32[2,16,32], index: 0, kind: input, shape index: {}]   ;;  %s2815_s1 = inlined_call_operand.vmem [shape: f32[2,16,16], index: 1, kind: input, shape index: {}]   ;;  %s2816_s2 = inlined_call_operand.vmem [shape: f32[1,32], index: 2, kind: input, shape index: {}]   ;;  %s2817_s3 = inlined_call_operand.vmem [shape: f32[1,32], index: 3, kind: input, shape index: {}]   ;;  %s2818_s4 = inlined_call_operand.vmem [shape: bf16[2,32,96], index: 4, kind: input, shape index: {}]   ;;  %s2819_s5 = inlined_call_operand.vmem [shape: f32[2,1,96], index: 5, kind: input, shape index: {}]   ;;  %s2820_s6 = inlined_call_operand.vmem [shape: bf16[2,32,32], index: 6, kind: input, shape index: {}]   ;;  %s2821_s7 = inlined_call_operand.vmem [shape: f32[2,1,32], index: 7, kind: input, shape index: {}]   ;;  %s2822_s8 = inlined_call_operand.vmem [shape: f32[2,1,32], index: 8, kind: input, shape index: {}]   ;;  %s2823_s9 = inlined_call_operand.vmem [shape: f32[2,1,32], index: 9, kind: input, shape index: {}]   ;;  %s2824_s10 = inlined_call_operand.vmem [shape: bf16[2,32,64], index: 10, kind: input, shape index: {}]   ;;  %s2825_s11 = inlined_call_operand.vmem [shape: f32[2,1,64], index: 11, kind: input, shape index: {}]   ;;  %s2826_s12 = inlined_call_operand.vmem [shape: bf16[2,64,32], index: 12, kind: input, shape index: {}]   ;;  %s2827_s13 = inlined_call_operand.vmem [shape: f32[2,1,32], index: 13, kind: input, shape index: {}]   ;;  %s2828_s14 = inlined_call_operand.vmem [shape: f32[2,1,32], index: 14, kind: input, shape index: {}]   ;;  %s2829_s15 = inlined_call_operand.vmem [shape: f32[2,1,32], index: 15, kind: input, shape index: {}]   ;;  %s2830_s16 = inlined_call_operand.vmem [shape: f32[1,32], index: 16, kind: input, shape index: {}]   ;;  %s2831_s17 = inlined_call_operand.vmem [shape: f32[2,2,1], index: 17, kind: output, shape index: {}]  }
   0x1   :  { %2833 = sst [smem:[#allocation2_spill]] %s2814_s0 }
   0x2   :  { %2834 = sst [smem:[#allocation3_spill]] %s2815_s1 }
   0x3 LB: > { %s2024_s25 = sadd.s32 4294967295, %s2397_s24   ;;  %p2028_p0 = scmp.ge.s32.totalorder %s2397_s24, 1  ;;  %s2397_s24 = sphi %s2497_s24, %s27_s24  }
   0x4   : > { %p497_p1 = scmp.lt.s32.totalorder %s2397_s24, 3 }
   0x6   : > { %p498_p2 = pnand %p2028_p0, %p497_p1 }
   0x7   : > { %p553_p3 = scmp.lt.s32.totalorder (!%p498_p2), %s2024_s25, 1  ;;  %s2835_s29 = sld [smem:[#allocation2_spill]] (!%p498_p2) }
   0x8   : > { %501 = sbr.rel (%p498_p2) target bundleno = 5304 (0x14b8), region = 88  ;;  %s2403_s30 = smov (!%p498_p2), 112  }
   0x9   : > { %s2836_s1 = sld [smem:[#allocation3_spill]] (!%p498_p2)  ;;  %s2405_s21 = smov (!%p498_p2), 48  }
   0xa   : > { %s2832_s18 = smov (!%p498_p2), 16  }
   0xd   : > { %s2839_s25 = smov (!%p553_p3, %s2024_s25), 1  ;;  %vm574_vm0 = vcmask 261120   ;;  %v2311_v14 = vld [vmem:[%s2818_s4 + $0x8] sm:$0xff]   ;;  %v2399_v15 = vmov 0.0   ;;  %vm2400_vm1 = vmmov 0   ;;  %v2312_v16 = vld [vmem:[%s2818_s4] sm:$0xff]  }
   0xe   : > { %s2119_s26 = sshll.u32 %s2839_s25, 4  ;;  %2165 = vmatprep.subr.bf16.mxu1 %v2399_v15  ;;  %2169 = vmatprep.mubr.msk.bf16.mxu1 %vm2400_vm1, %v2399_v15  ;;  %v2034_v25 = vld [vmem:[%s2816_s2] ss:$0 sm:$0xff]  ;;  %vm693_vm2 = vcmask 130048   ;;  %vm1183_vm3 = vcmask 523264   ;;  %vm1943_vm4 = vcmask 1040384  }
   0xf   : > { %s557_s0 = scalar_lea.vmem %s2835_s29, %s2119_s26  ;;  %2166 = vmatpush3.bf16.msra.mxu1 %v2311_v14  ;;  %2179 = vmatprep.subr.bf16.mxu0 %v2399_v15  ;;  %v2035_v29 = vld [vmem:[%s2817_s3] ss:$0 sm:$0xff]  ;;  %s2401_s29 = smov 80   ;;  %vm1953_vm5 = vcmask 254976   ;;  %vm1957_vm6 = vcmask 1024  }
  0x10   : > { %v568_v0 = vld [vmem:[%s557_s0] sm:$0xff]  ;;  %v569_v1 = vld [vmem:[%s557_s0 + $0x8] sm:$0xff]  ;;  %2167 = vmatprep.subr.bf16.mxu1 %v2399_v15  ;;  %2181 = vmatprep.mubr.msk.bf16.mxu0 %vm2400_vm1, %v2399_v15  ;;  %s2402_s0 = smov 96   ;;  %s562_s20 = scalar_lea.vmem %s2836_s1, %s2119_s26 }
  0x11   : > { %v575_v2 = vsel %vm574_vm0, %v568_v0, 0.0  ;;  %v578_v3 = vsel %vm574_vm0, %v569_v1, 0.0  ;;  %v2036_v35 = vld [vmem:[%s2819_s5] ss:$0 sm:$0xff]  ;;  %v2574_v54 = vld [vmem:[%s562_s20 + $0x8] sm:$0xff]  ;;  %s2404_s26 = smov 64  }
  0x12   : > { %576 = vadd.xlane.f32.xlu0 %v575_v2  ;;  %v2571_v50 = vld [vmem:[%s562_s20] sm:$0xff]  ;;  %s2033_s22 = sshll.u32 %s2839_s25, 1 }
  0x13   : > { %2168 = vmatpush3.bf16.msra.mxu1 %v2312_v16  ;;  %s566_s27 = scalar_lea.vmem %s2831_s17, %s2033_s22 }
  0x14   : > { %2173 = vmatprep.subr.bf16.mxu1 %v2399_v15 }
  0x16   : > { %579 = vadd.xlane.f32.xlu0 %v578_v3 }
  0x9b   : > { %v577_v4 = vpop.xlane.xlu0 %576 }
  0x9c   : > { %v582_v5 = vmul.f32 0.03125, %v577_v4 }
  0x9e   : > { %v584_v6 = vsub.f32 %v568_v0, %v582_v5 }
  0x9f   : > { %v580_v7 = vpop.xlane.xlu0 %579 }
  0xa0   : > { %v583_v8 = vmul.f32 0.03125, %v580_v7  ;;  %v586_v9 = vmul.f32 %v584_v6, %v584_v6 }
  0xa2   : > { %v585_v10 = vsub.f32 %v569_v1, %v583_v8  ;;  %v588_v11 = vsel %vm574_vm0, %v586_v9, 0.0 }
  0xa3   : > { %589 = vadd.xlane.f32.xlu1 %v588_v11 }
  0xa4   : > { %v587_v12 = vmul.f32 %v585_v10, %v585_v10 }
  0xa6   : > { %v591_v13 = vsel %vm574_vm0, %v587_v12, 0.0 }
  0xa7   : > { %592 = vadd.xlane.f32.xlu1 %v591_v13 }
 0x12c   : > { %v590_v17 = vpop.xlane.xlu1 %589 }
 0x12d   : > { %v594_v18 = vmul.f32 0.03125, %v590_v17 }
 0x12f   : > { %v596_v19 = vadd.f32 1e-12, %v594_v18 }
 0x130   : > { %v593_v20 = vpop.xlane.xlu1 %592 }
 0x131   : > { %2331 = vrsqrt.f32 %v596_v19  ;;  %v595_v21 = vmul.f32 0.03125, %v593_v20 }
 0x133   : > { %v597_v22 = vadd.f32 1e-12, %v595_v21 }
 0x135   : > { %2333 = vrsqrt.f32 %v597_v22 }
 0x13e   : > { %v2332_v23 = vpop.eup %2331 }
 0x13f   : > { %v600_v24 = vmul.f32 %v2332_v23, %v584_v6 }
 0x141   : > { %v608_v28 = vmul.f32 %v2034_v25, %v600_v24 }
 0x142   : > { %v2334_v26 = vpop.eup %2333 }
 0x143   : > { %v601_v27 = vmul.f32 %v2334_v26, %v585_v10  ;;  %v2537_v31 = vadd.f32 %v2035_v29, %v608_v28 }
 0x145   : > { %v609_v30 = vmul.f32 %v2034_v25, %v601_v27 }
 0x147   : > { %v2539_v32 = vadd.f32 %v2035_v29, %v609_v30 }
 0x149   : > { %v622_v33 = vpack.c.bf16 %v2539_v32, %v2537_v31 }
 0x14b   : > { %2170 = vmatmul.mubr.msk.bf16.vlgmr.msra.gmra.mxu1 %vm574_vm0, %v622_v33 }
 0x14c   : > { %2175 = vmatprep.mubr.msk.bf16.mxu1 %vm2400_vm1, %v2399_v15 }
 0x20b   : > { %v679_v34 = vpop.f32.mrf.mxu1 }
 0x20c   : > { %v680_v38 = vadd.f32 %v2036_v35, %v679_v34 }
 0x20d   : > { %v2171_v36 = vpop.f32.mrf.mxu1 }
 0x20e   : > { %v686_v43 = vmul.f32 0.25, %v680_v38 }
 0x20f   : > { %v682_v37 = vpop.f32.mrf.mxu1 }
 0x210   : > { %v683_v39 = vadd.f32 %v2036_v35, %v682_v37 }
 0x211   : > { %v2172_v40 = vpop.f32.mrf.mxu1 }
 0x212   : > { %v687_v41 = vmul.f32 0.25, %v683_v39  ;;  %v2549_v42 = vpack.c.bf16 %v683_v39, %v680_v38 }
 0x214   : > { %814 = vrot.lane.b32.xlu1 %v2549_v42, %s2401_s29  ;;  %691 = vrot.lane.b32.xlu0 %v2549_v42, %s2402_s0  ;;  %v688_v44 = vpack.c.bf16 %v687_v41, %v686_v43  ;;  %v2313_v43 = vld [vmem:[%s2820_s6 + $0x8] sm:$0xff]  }
 0x218   : > { %812 = vrot.lane.b32.xlu1 %v688_v44, %s2403_s30 }
 0x286   : > { %v692_v45 = vpop.permute.xlu0 %691  ;;  %v815_v47 = vpop.permute.xlu1 %814 }
 0x287   : > { %v698_v46 = vsel %vm693_vm2, %v692_v45, 0  ;;  %v820_v48 = vsel %vm693_vm2, %v815_v47, 0 }
 0x288   : > { %2174 = vmatpush3.bf16.xpose.msra.mxu1 %v698_v46  ;;  %v2314_v46 = vld [vmem:[%s2820_s6] sm:$0xff]  }
 0x289   : > { %2185 = vmatprep.subr.bf16.mxu1 %v2399_v15 }
 0x28a   : > { %v813_v49 = vpop.permute.xlu1 %812 }
 0x28f   : > { %2176 = vmatmul.mubr.msk.bf16.vlgmr.msra.gmra.mxu1 %vm693_vm2, %v688_v44 }
 0x290   : > { %2186 = vmatpush3.bf16.xpose.msra.mxu1 %v820_v48  ;;  %2187 = vmatprep.mubr.msk.bf16.mxu1 %vm2400_vm1, %v2399_v15 }
 0x291   : > { %2197 = vmatprep.subr.bf16.mxu1 %v2399_v15 }
 0x297   : > { %2188 = vmatmul.mubr.msk.bf16.vlgmr.msra.gmra.mxu1 %vm693_vm2, %v813_v49 }
 0x298   : > { %2201 = vmatprep.mubr.msk.bf16.mxu1 %vm2400_vm1, %v2399_v15  ;;  %2198 = vmatpush3.bf16.msra.mxu1 %v2313_v43  ;;  %v2050_v43 = vld [vmem:[%s2825_s11] ss:$0 sm:$0xff] }
 0x299   : > { %2199 = vmatprep.subr.bf16.mxu1 %v2399_v15 }
 0x29c   : > { %2200 = vmatpush3.bf16.msra.mxu1 %v2314_v46 }
 0x29d   : > { %2213 = vmatprep.subr.bf16.mxu1 %v2399_v15 }
 0x34f   : > { %v734_v51 = vpop.f32.mrf.mxu1 }
 0x350   : > { %v735_v52 = vadd.f32 %v734_v51, %v2571_v50 }
 0x351   : > { %v2177_v53 = vpop.f32.mrf.mxu1 }
 0x352   : > { %v741_v55 = vsel %vm693_vm2, %v735_v52, -inf }
 0x353   : > { %742 = vmax.xlane.f32.xlu1 %v741_v55  ;;  %v737_v56 = vpop.f32.mrf.mxu1 }
 0x354   : > { %v738_v57 = vadd.f32 %v737_v56, %v2574_v54 }
 0x355   : > { %v2178_v58 = vpop.f32.mrf.mxu1 }
 0x356   : > { %v744_v59 = vsel %vm693_vm2, %v738_v57, -inf }
 0x357   : > { %745 = vmax.xlane.f32.xlu0 %v744_v59  ;;  %v856_v60 = vpop.f32.mrf.mxu1 }
 0x358   : > { %v857_v61 = vadd.f32 %v856_v60, %v2571_v50 }
 0x359   : > { %v2189_v62 = vpop.f32.mrf.mxu1 }
 0x35a   : > { %v863_v63 = vsel %vm693_vm2, %v857_v61, -inf  ;;  %v2044_v62 = vld [vmem:[%s2821_s7] ss:$0 sm:$0xff] }
 0x35b   : > { %864 = vmax.xlane.f32.xlu0 %v863_v63  ;;  %v859_v0 = vpop.f32.mrf.mxu1 }
 0x35c   : > { %v860_v1 = vadd.f32 %v859_v0, %v2574_v54 }
 0x35d   : > { %v2190_v2 = vpop.f32.mrf.mxu1 }
 0x35e   : > { %v866_v3 = vsel %vm693_vm2, %v860_v1, -inf }
 0x35f   : > { %867 = vmax.xlane.f32.xlu0 %v866_v3 }
 0x3dc   : > { %v743_v4 = vpop.xlane.xlu1 %742 }
 0x3dd   : > { %v747_v5 = vsub.f32 %v735_v52, %v743_v4 }
 0x3df   : > { %v749_v6 = vmul.f32 1.442695, %v747_v5 }
 0x3e0   : > { %v746_v7 = vpop.xlane.xlu0 %745 }
 0x3e1   : > { %2335 = vpow2.f32 %v749_v6  ;;  %v748_v8 = vsub.f32 %v738_v57, %v746_v7 }
 0x3e3   : > { %v751_v9 = vmul.f32 1.442695, %v748_v8 }
 0x3e4   : > { %v865_v10 = vpop.xlane.xlu0 %864 }
 0x3e5   : > { %2337 = vpow2.f32 %v751_v9  ;;  %v869_v11 = vsub.f32 %v857_v61, %v865_v10 }
 0x3e7   : > { %v871_v12 = vmul.f32 1.442695, %v869_v11 }
 0x3e8   : > { %v868_v13 = vpop.xlane.xlu0 %867 }
 0x3e9   : > { %2339 = vpow2.f32 %v871_v12  ;;  %v870_v14 = vsub.f32 %v860_v1, %v868_v13 }
 0x3eb   : > { %v873_v16 = vmul.f32 1.442695, %v870_v14 }
 0x3ed   : > { %2341 = vpow2.f32 %v873_v16 }
 0x3ee   : > { %v2336_v17 = vpop.eup %2335 }
 0x3ef   : > { %v753_v18 = vsel %vm693_vm2, %v2336_v17, 0.0 }
 0x3f0   : > { %754 = vadd.xlane.f32.xlu1 %v753_v18 }
 0x3f2   : > { %v2338_v19 = vpop.eup %2337 }
 0x3f3   : > { %v756_v20 = vsel %vm693_vm2, %v2338_v19, 0.0 }
 0x3f4   : > { %757 = vadd.xlane.f32.xlu0 %v756_v20 }
 0x3f6   : > { %v2340_v21 = vpop.eup %2339 }
 0x3f7   : > { %v875_v22 = vsel %vm693_vm2, %v2340_v21, 0.0 }
 0x3f8   : > { %876 = vadd.xlane.f32.xlu1 %v875_v22 }
 0x3fa   : > { %v2342_v23 = vpop.eup %2341 }
 0x3fb   : > { %v878_v24 = vsel %vm693_vm2, %v2342_v23, 0.0 }
 0x3fc   : > { %879 = vadd.xlane.f32.xlu0 %v878_v24 }
 0x409   : > { %764 = vrot.lane.b32.xlu1 %v2549_v42, %s2404_s26 }
 0x412   : > { %886 = vrot.lane.b32.xlu0 %v2549_v42, %s2405_s21 }
 0x479   : > { %v755_v25 = vpop.xlane.xlu1 %754 }
 0x47a   : > { %2343 = vrcp.f32 %v755_v25 }
 0x47d   : > { %v758_v26 = vpop.xlane.xlu0 %757 }
 0x47e   : > { %2345 = vrcp.f32 %v758_v26 }
 0x481   : > { %v877_v27 = vpop.xlane.xlu1 %876 }
 0x482   : > { %2347 = vrcp.f32 %v877_v27 }
 0x485   : > { %v765_v28 = vpop.permute.xlu1 %764  ;;  %v880_v29 = vpop.xlane.xlu0 %879 }
 0x486   : > { %2349 = vrcp.f32 %v880_v29  ;;  %2180 = vmatpush3.bf16.msra.mxu0 %v765_v28  ;;  %v2048_v28 = vld [vmem:[%s2822_s8] ss:$0 sm:$0xff] }
 0x487   : > { %2191 = vmatprep.subr.bf16.mxu0 %v2399_v15  ;;  %v2344_v30 = vpop.eup %2343 }
 0x488   : > { %v761_v34 = vmul.f32 %v2344_v30, %v2336_v17 }
 0x489   : > { %v887_v37 = vpop.permute.xlu0 %886 }
 0x48b   : > { %v2346_v33 = vpop.eup %2345 }
 0x48c   : > { %v762_v35 = vmul.f32 %v2346_v33, %v2338_v19  ;;  %v2316_v19 = vld [vmem:[%s2824_s10] sm:$0xff]  }
 0x48e   : > { %v763_v36 = vpack.c.bf16 %v762_v35, %v761_v34  ;;  %v2049_v34 = vld [vmem:[%s2823_s9] ss:$0 sm:$0xff] }
 0x48f   : > { %v2348_v38 = vpop.eup %2347 }
 0x490   : > { %2182 = vmatmul.mubr.msk.bf16.vlgmr.msra.gmra.mxu0 %vm693_vm2, %v763_v36  ;;  %v883_v40 = vmul.f32 %v2348_v38, %v2340_v21 }
 0x491   : > { %2192 = vmatpush3.bf16.msra.mxu0 %v887_v37  ;;  %2193 = vmatprep.mubr.msk.bf16.mxu0 %vm2400_vm1, %v2399_v15 }
 0x492   : > { %2205 = vmatprep.subr.bf16.mxu0 %v2399_v15 }
 0x493   : > { %v2350_v39 = vpop.eup %2349 }
 0x494   : > { %v884_v41 = vmul.f32 %v2350_v39, %v2342_v23  ;;  %v2317_v39 = vld [vmem:[%s2826_s12 + $0x18] sm:$0xff]  }
 0x496   : > { %v885_v42 = vpack.c.bf16 %v884_v41, %v883_v40  ;;  %v2318_v40 = vld [vmem:[%s2826_s12 + $0x10] sm:$0xff]   ;;  %v2319_v41 = vld [vmem:[%s2826_s12 + $0x8] sm:$0xff]  }
 0x498   : > { %2194 = vmatmul.mubr.msk.bf16.vlgmr.msra.gmra.mxu0 %vm693_vm2, %v885_v42  ;;  %v2320_v42 = vld [vmem:[%s2826_s12] sm:$0xff]  }
 0x499   : > { %2209 = vmatprep.mubr.msk.bf16.mxu0 %vm2400_vm1, %v2399_v15 }
 0x550   : > { %v804_v44 = vpop.f32.mrf.mxu0 }
 0x552   : > { %v2183_v45 = vpop.f32.mrf.mxu0 }
 0x554   : > { %v807_v47 = vpop.f32.mrf.mxu0 }
 0x556   : > { %v2184_v48 = vpop.f32.mrf.mxu0 }
 0x558   : > { %v926_v49 = vpop.f32.mrf.mxu0 }
 0x55a   : > { %v2195_v51 = vpop.f32.mrf.mxu0 }
 0x55c   : > { %v929_v52 = vpop.f32.mrf.mxu0 }
 0x55d   : > { %v2301_v53 = vpack.i.bf16 %v929_v52, %v926_v49 }
 0x55e   : > { %v2196_v55 = vpop.f32.mrf.mxu0 }
 0x55f   : > { %2302 = vrot.lane.b32.xlu1 %v2301_v53, %s2832_s18 }
 0x5d1   : > { %v2303_v56 = vpop.permute.xlu1 %2302 }
 0x5d2   : > { %v2305_v57 = vunpack.i.h.bf16 %v2303_v56  ;;  %v2304_v58 = vunpack.i.l.bf16 %v2303_v56 }
 0x5d4   : > { %v942_v59 = vsel %vm693_vm2, %v807_v47, %v2305_v57  ;;  %v941_v60 = vsel %vm693_vm2, %v804_v44, %v2304_v58 }
 0x5d5   : > { %v947_v61 = vpack.c.bf16 %v942_v59, %v941_v60 }
 0x5d7   : > { %2202 = vmatmul.mubr.msk.bf16.vlgmr.msra.gmra.mxu1 %vm574_vm0, %v947_v61 }
 0x5d8   : > { %2221 = vmatprep.mubr.msk.bf16.mxu1 %vm2400_vm1, %v2399_v15  ;;  %2214 = vmatpush3.bf16.msra.mxu1 %v2317_v39  ;;  %v2060_v39 = vld [vmem:[%s2828_s14] ss:$0 sm:$0xff] }
 0x5d9   : > { %2215 = vmatprep.subr.bf16.mxu1 %v2399_v15 }
 0x5dc   : > { %2216 = vmatpush3.bf16.msra.mxu1 %v2318_v40 }
 0x5dd   : > { %2217 = vmatprep.subr.bf16.mxu1 %v2399_v15 }
 0x5e0   : > { %2218 = vmatpush3.bf16.msra.mxu1 %v2319_v41 }
 0x5e1   : > { %2219 = vmatprep.subr.bf16.mxu1 %v2399_v15 }
 0x5e4   : > { %2220 = vmatpush3.bf16.msra.mxu1 %v2320_v42 }
 0x5e5   : > { %2239 = vmatprep.subr.bf16.mxu1 %v2399_v15 }
 0x697   : > { %v1004_v63 = vpop.f32.mrf.mxu1 }
 0x698   : > { %v1005_v0 = vadd.f32 %v2044_v62, %v1004_v63 }
 0x699   : > { %v2203_v1 = vpop.f32.mrf.mxu1 }
 0x69a   : > { %v1011_v2 = vadd.f32 %v1005_v0, %v2537_v31 }
 0x69b   : > { %v1007_v3 = vpop.f32.mrf.mxu1 }
 0x69c   : > { %v1008_v4 = vadd.f32 %v2044_v62, %v1007_v3  ;;  %v1015_v5 = vsel %vm574_vm0, %v1011_v2, 0.0 }
 0x69d   : > { %1016 = vadd.xlane.f32.xlu1 %v1015_v5  ;;  %v2204_v6 = vpop.f32.mrf.mxu1 }
 0x69e   : > { %v1012_v7 = vadd.f32 %v1008_v4, %v2539_v32  ;;  %v2315_v32 = vld [vmem:[%s2824_s10 + $0x8] sm:$0xff]  }
 0x69f   : > { %2206 = vmatpush3.bf16.msra.mxu0 %v2315_v32 }
 0x6a0   : > { %v1018_v8 = vsel %vm574_vm0, %v1012_v7, 0.0  ;;  %2207 = vmatprep.subr.bf16.mxu0 %v2399_v15 }
 0x6a1   : > { %1019 = vadd.xlane.f32.xlu0 %v1018_v8 }
 0x6a3   : > { %2208 = vmatpush3.bf16.msra.mxu0 %v2316_v19 }
 0x6a4   : > { %2225 = vmatprep.subr.bf16.mxu0 %v2399_v15 }
 0x726   : > { %v1017_v9 = vpop.xlane.xlu1 %1016 }
 0x727   : > { %v1021_v10 = vmul.f32 0.03125, %v1017_v9 }
 0x729   : > { %v1023_v11 = vsub.f32 %v1011_v2, %v1021_v10 }
 0x72a   : > { %v1020_v12 = vpop.xlane.xlu0 %1019 }
 0x72b   : > { %v1022_v13 = vmul.f32 0.03125, %v1020_v12  ;;  %v1025_v14 = vmul.f32 %v1023_v11, %v1023_v11 }
 0x72d   : > { %v1024_v16 = vsub.f32 %v1012_v7, %v1022_v13  ;;  %v1027_v31 = vsel %vm574_vm0, %v1025_v14, 0.0  ;;  %v2054_v7 = vld [vmem:[%s2827_s13] ss:$0 sm:$0xff] }
 0x72e   : > { %1028 = vadd.xlane.f32.xlu0 %v1027_v31 }
 0x72f   : > { %v1026_v17 = vmul.f32 %v1024_v16, %v1024_v16 }
 0x731   : > { %v1030_v18 = vsel %vm574_vm0, %v1026_v17, 0.0 }
 0x732   : > { %1031 = vadd.xlane.f32.xlu1 %v1030_v18 }
 0x7b7   : > { %v1029_v20 = vpop.xlane.xlu0 %1028 }
 0x7b8   : > { %v1033_v21 = vmul.f32 0.03125, %v1029_v20 }
 0x7ba   : > { %v1035_v22 = vadd.f32 1e-12, %v1033_v21 }
 0x7bb   : > { %v1032_v23 = vpop.xlane.xlu1 %1031 }
 0x7bc   : > { %2351 = vrsqrt.f32 %v1035_v22  ;;  %v1034_v24 = vmul.f32 0.03125, %v1032_v23 }
 0x7be   : > { %v1036_v25 = vadd.f32 1e-12, %v1034_v24 }
 0x7c0   : > { %2353 = vrsqrt.f32 %v1036_v25 }
 0x7c9   : > { %v2352_v26 = vpop.eup %2351 }
 0x7ca   : > { %v1039_v27 = vmul.f32 %v2352_v26, %v1023_v11 }
 0x7cc   : > { %v1047_v33 = vmul.f32 %v2048_v28, %v1039_v27  ;;  %v2321_v27 = vld [vmem:[%s2818_s4 + $0x18] sm:$0xff]  }
 0x7cd   : > { %v2354_v29 = vpop.eup %2353 }
 0x7ce   : > { %v1040_v30 = vmul.f32 %v2354_v29, %v1024_v16  ;;  %v1055_v36 = vadd.f32 %v2049_v34, %v1047_v33 }
 0x7d0   : > { %v1048_v35 = vmul.f32 %v2048_v28, %v1040_v30  ;;  %v2322_v28 = vld [vmem:[%s2818_s4 + $0x10] sm:$0xff]  }
 0x7d2   : > { %v1056_v37 = vadd.f32 %v2049_v34, %v1048_v35 }
 0x7d4   : > { %v1061_v38 = vpack.c.bf16 %v1056_v37, %v1055_v36 }
 0x7d6   : > { %2210 = vmatmul.mubr.msk.bf16.vlgmr.msra.gmra.mxu0 %vm574_vm0, %v1061_v38 }
 0x7d7   : > { %2229 = vmatprep.mubr.msk.bf16.mxu0 %vm2400_vm1, %v2399_v15  ;;  %2226 = vmatpush3.bf16.msra.mxu0 %v2321_v27 }
 0x7d8   : > { %2227 = vmatprep.subr.bf16.mxu0 %v2399_v15 }
 0x7db   : > { %2228 = vmatpush3.bf16.msra.mxu0 %v2322_v28 }
 0x7dc   : > { %2233 = vmatprep.subr.bf16.mxu0 %v2399_v15 }
 0x896   : > { %v1118_v44 = vpop.f32.mrf.mxu0 }
 0x897   : > { %v1119_v45 = vadd.f32 %v2050_v43, %v1118_v44 }
 0x898   : > { %v2211_v46 = vpop.f32.mrf.mxu0 }
 0x899   : > { %v1127_v47 = vmul.f32 0.044715, %v1119_v45  ;;  %v1125_v1 = vmul.f32 0.5, %v1119_v45 }
 0x89a   : > { %v1121_v48 = vpop.f32.mrf.mxu0 }
 0x89b   : > { %v1129_v49 = vmul.f32 %v1127_v47, %v1119_v45  ;;  %v1122_v51 = vadd.f32 %v2050_v43, %v1121_v48  ;;  %v2061_v43 = vld [vmem:[%s2829_s15] ss:$0 sm:$0xff] }
 0x89c   : > { %v2212_v52 = vpop.f32.mrf.mxu0 }
 0x89d   : > { %v1131_v53 = vmul.f32 %v1129_v49, %v1119_v45  ;;  %v1128_v55 = vmul.f32 0.044715, %v1122_v51  ;;  %v1126_v2 = vmul.f32 0.5, %v1122_v51  ;;  %v2067_v49 = vld [vmem:[%s2819_s5 + $0x1] ss:$0 sm:$0xff] }
 0x89f   : > { %v1133_v56 = vadd.f32 %v1131_v53, %v1119_v45  ;;  %v1130_v57 = vmul.f32 %v1128_v55, %v1122_v51 }
 0x8a1   : > { %v1135_v58 = vmul.f32 0.7978846, %v1133_v56  ;;  %v1132_v59 = vmul.f32 %v1130_v57, %v1122_v51 }
 0x8a3   : > { %2355 = vtanh.f32 %v1135_v58  ;;  %v1134_v60 = vadd.f32 %v1132_v59, %v1122_v51 }
 0x8a5   : > { %v1136_v61 = vmul.f32 0.7978846, %v1134_v60 }
 0x8a7   : > { %2357 = vtanh.f32 %v1136_v61 }
 0x8b0   : > { %v2356_v62 = vpop.eup %2355 }
 0x8b1   : > { %v1139_v63 = vadd.f32 1.0, %v2356_v62 }
 0x8b3   : > { %v1141_v4 = vmul.f32 %v1139_v63, %v1125_v1 }
 0x8b4   : > { %v2358_v0 = vpop.eup %2357 }
 0x8b5   : > { %v1140_v3 = vadd.f32 1.0, %v2358_v0 }
 0x8b7   : > { %v1142_v5 = vmul.f32 %v1140_v3, %v1126_v2 }
 0x8b9   : > { %v1151_v6 = vpack.c.bf16 %v1142_v5, %v1141_v4 }
 0x8bb   : > { %2222 = vmatmul.mubr.msk.bf16.vlgmr.msra.gmra.mxu1 %vm1183_vm3, %v1151_v6 }
 0x8bc   : > { %2241 = vmatprep.mubr.msk.bf16.mxu1 %vm2400_vm1, %v2399_v15 }
 0x97b   : > { %v1221_v8 = vpop.f32.mrf.mxu1 }
 0x97c   : > { %v1222_v9 = vadd.f32 %v2054_v7, %v1221_v8 }
 0x97d   : > { %v2223_v10 = vpop.f32.mrf.mxu1 }
 0x97e   : > { %v1228_v11 = vadd.f32 %v1222_v9, %v1055_v36 }
 0x97f   : > { %v1224_v12 = vpop.f32.mrf.mxu1 }
 0x980   : > { %v1225_v13 = vadd.f32 %v2054_v7, %v1224_v12  ;;  %v1232_v14 = vsel %vm574_vm0, %v1228_v11, 0.0 }
 0x981   : > { %1233 = vadd.xlane.f32.xlu0 %v1232_v14  ;;  %v2224_v16 = vpop.f32.mrf.mxu1 }
 0x982   : > { %v1229_v31 = vadd.f32 %v1225_v13, %v1056_v37 }
 0x984   : > { %v1235_v17 = vsel %vm574_vm0, %v1229_v31, 0.0 }
 0x985   : > { %1236 = vadd.xlane.f32.xlu1 %v1235_v17 }
 0xa0a   : > { %v1234_v18 = vpop.xlane.xlu0 %1233 }
 0xa0b   : > { %v1238_v32 = vmul.f32 0.03125, %v1234_v18 }
 0xa0d   : > { %v1240_v19 = vsub.f32 %v1228_v11, %v1238_v32 }
 0xa0e   : > { %v1237_v20 = vpop.xlane.xlu1 %1236 }
 0xa0f   : > { %v1239_v21 = vmul.f32 0.03125, %v1237_v20  ;;  %v1242_v22 = vmul.f32 %v1240_v19, %v1240_v19 }
 0xa11   : > { %v1241_v23 = vsub.f32 %v1229_v31, %v1239_v21  ;;  %v1244_v24 = vsel %vm574_vm0, %v1242_v22, 0.0 }
 0xa12   : > { %1245 = vadd.xlane.f32.xlu0 %v1244_v24 }
 0xa13   : > { %v1243_v25 = vmul.f32 %v1241_v23, %v1241_v23 }
 0xa15   : > { %v1247_v26 = vsel %vm574_vm0, %v1243_v25, 0.0 }
 0xa16   : > { %1248 = vadd.xlane.f32.xlu1 %v1247_v26 }
 0xa9b   : > { %v1246_v29 = vpop.xlane.xlu0 %1245 }
 0xa9c   : > { %v1250_v30 = vmul.f32 0.03125, %v1246_v29 }
 0xa9e   : > { %v1252_v33 = vadd.f32 1e-12, %v1250_v30 }
 0xa9f   : > { %v1249_v34 = vpop.xlane.xlu1 %1248 }
 0xaa0   : > { %2359 = vrsqrt.f32 %v1252_v33  ;;  %v1251_v35 = vmul.f32 0.03125, %v1249_v34 }
 0xaa2   : > { %v1253_v36 = vadd.f32 1e-12, %v1251_v35 }
 0xaa4   : > { %2361 = vrsqrt.f32 %v1253_v36 }
 0xaad   : > { %v2360_v37 = vpop.eup %2359 }
 0xaae   : > { %v1256_v38 = vmul.f32 %v2360_v37, %v1240_v19 }
 0xab0   : > { %v1264_v42 = vmul.f32 %v2060_v39, %v1256_v38 }
 0xab1   : > { %v2362_v40 = vpop.eup %2361 }
 0xab2   : > { %v1257_v41 = vmul.f32 %v2362_v40, %v1241_v23  ;;  %v2682_v45 = vadd.f32 %v2061_v43, %v1264_v42 }
 0xab4   : > { %v1265_v44 = vmul.f32 %v2060_v39, %v1257_v41 }
 0xab6   : > { %v2684_v46 = vadd.f32 %v2061_v43, %v1265_v44 }
 0xab8   : > { %v1279_v47 = vpack.c.bf16 %v2684_v46, %v2682_v45 }
 0xaba   : > { %2230 = vmatmul.mubr.msk.bf16.vlgmr.msra.gmra.mxu0 %vm574_vm0, %v1279_v47 }
 0xabb   : > { %2235 = vmatprep.mubr.msk.bf16.mxu0 %vm2400_vm1, %v2399_v15 }
 0xb7a   : > { %v1337_v48 = vpop.f32.mrf.mxu0 }
 0xb7b   : > { %v1338_v53 = vadd.f32 %v2067_v49, %v1337_v48 }
 0xb7c   : > { %v2231_v51 = vpop.f32.mrf.mxu0 }
 0xb7d   : > { %v1344_v59 = vmul.f32 0.25, %v1338_v53 }
 0xb7e   : > { %v1340_v52 = vpop.f32.mrf.mxu0 }
 0xb7f   : > { %v1341_v55 = vadd.f32 %v2067_v49, %v1340_v52 }
 0xb80   : > { %v2232_v56 = vpop.f32.mrf.mxu0 }
 0xb81   : > { %v1345_v57 = vmul.f32 0.25, %v1341_v55  ;;  %v2694_v58 = vpack.c.bf16 %v1341_v55, %v1338_v53 }
 0xb83   : > { %1471 = vrot.lane.b32.xlu1 %v2694_v58, %s2401_s29  ;;  %1349 = vrot.lane.b32.xlu0 %v2694_v58, %s2402_s0  ;;  %v1346_v60 = vpack.c.bf16 %v1345_v57, %v1344_v59  ;;  %v2323_v57 = vld [vmem:[%s2820_s6 + $0x18] sm:$0xff]  }
 0xb87   : > { %1469 = vrot.lane.b32.xlu1 %v1346_v60, %s2403_s30 }
 0xbf5   : > { %v1350_v61 = vpop.permute.xlu0 %1349  ;;  %v1472_v63 = vpop.permute.xlu1 %1471 }
 0xbf6   : > { %v1355_v62 = vsel %vm693_vm2, %v1350_v61, 0  ;;  %v1477_v0 = vsel %vm693_vm2, %v1472_v63, 0 }
 0xbf7   : > { %2234 = vmatpush3.bf16.xpose.msra.mxu0 %v1355_v62 }
 0xbf8   : > { %2245 = vmatprep.subr.bf16.mxu0 %v2399_v15 }
 0xbf9   : > { %v1470_v1 = vpop.permute.xlu1 %1469 }
 0xbfe   : > { %2236 = vmatmul.mubr.msk.bf16.vlgmr.msra.gmra.mxu0 %vm693_vm2, %v1346_v60  ;;  %v2324_v60 = vld [vmem:[%s2820_s6 + $0x10] sm:$0xff]  }
 0xbff   : > { %2246 = vmatpush3.bf16.xpose.msra.mxu0 %v1477_v0  ;;  %2247 = vmatprep.mubr.msk.bf16.mxu0 %vm2400_vm1, %v2399_v15 }
 0xc00   : > { %2257 = vmatprep.subr.bf16.mxu0 %v2399_v15 }
 0xc06   : > { %2248 = vmatmul.mubr.msk.bf16.vlgmr.msra.gmra.mxu0 %vm693_vm2, %v1470_v1 }
 0xc07   : > { %2261 = vmatprep.mubr.msk.bf16.mxu0 %vm2400_vm1, %v2399_v15  ;;  %2258 = vmatpush3.bf16.msra.mxu0 %v2323_v57 }
 0xc08   : > { %2259 = vmatprep.subr.bf16.mxu0 %v2399_v15 }
 0xc0b   : > { %2260 = vmatpush3.bf16.msra.mxu0 %v2324_v60 }
 0xc0c   : > { %2273 = vmatprep.subr.bf16.mxu0 %v2399_v15 }
 0xcbe   : > { %v1391_v2 = vpop.f32.mrf.mxu0 }
 0xcbf   : > { %v1392_v3 = vadd.f32 %v1391_v2, %v2571_v50 }
 0xcc0   : > { %v2237_v4 = vpop.f32.mrf.mxu0 }
 0xcc1   : > { %v1398_v5 = vsel %vm693_vm2, %v1392_v3, -inf }
 0xcc2   : > { %1399 = vmax.xlane.f32.xlu1 %v1398_v5  ;;  %v1394_v6 = vpop.f32.mrf.mxu0 }
 0xcc3   : > { %v1395_v7 = vadd.f32 %v1394_v6, %v2574_v54 }
 0xcc4   : > { %v2238_v8 = vpop.f32.mrf.mxu0 }
 0xcc5   : > { %v1401_v9 = vsel %vm693_vm2, %v1395_v7, -inf }
 0xcc6   : > { %1402 = vmax.xlane.f32.xlu0 %v1401_v9  ;;  %v1513_v10 = vpop.f32.mrf.mxu0 }
 0xcc7   : > { %v1514_v11 = vadd.f32 %v1513_v10, %v2571_v50  ;;  %v2080_v10 = vld [vmem:[%s2821_s7 + $0x1] ss:$0 sm:$0xff] }
 0xcc8   : > { %v2249_v12 = vpop.f32.mrf.mxu0 }
 0xcc9   : > { %v1520_v13 = vsel %vm693_vm2, %v1514_v11, -inf }
 0xcca   : > { %1521 = vmax.xlane.f32.xlu0 %v1520_v13  ;;  %v1516_v14 = vpop.f32.mrf.mxu0 }
 0xccb   : > { %v1517_v16 = vadd.f32 %v1516_v14, %v2574_v54 }
 0xccc   : > { %v2250_v31 = vpop.f32.mrf.mxu0 }
 0xccd   : > { %v1523_v17 = vsel %vm693_vm2, %v1517_v16, -inf }
 0xcce   : > { %1524 = vmax.xlane.f32.xlu0 %v1523_v17 }
 0xd4b   : > { %v1400_v18 = vpop.xlane.xlu1 %1399 }
 0xd4c   : > { %v1404_v32 = vsub.f32 %v1392_v3, %v1400_v18 }
 0xd4e   : > { %v1406_v19 = vmul.f32 1.442695, %v1404_v32 }
 0xd4f   : > { %v1403_v20 = vpop.xlane.xlu0 %1402 }
 0xd50   : > { %2363 = vpow2.f32 %v1406_v19  ;;  %v1405_v21 = vsub.f32 %v1395_v7, %v1403_v20 }
 0xd52   : > { %v1408_v22 = vmul.f32 1.442695, %v1405_v21 }
 0xd53   : > { %v1522_v23 = vpop.xlane.xlu0 %1521 }
 0xd54   : > { %2365 = vpow2.f32 %v1408_v22  ;;  %v1526_v50 = vsub.f32 %v1514_v11, %v1522_v23 }
 0xd56   : > { %v1528_v24 = vmul.f32 1.442695, %v1526_v50 }
 0xd57   : > { %v1525_v25 = vpop.xlane.xlu0 %1524 }
 0xd58   : > { %2367 = vpow2.f32 %v1528_v24  ;;  %v1527_v26 = vsub.f32 %v1517_v16, %v1525_v25 }
 0xd5a   : > { %v1530_v27 = vmul.f32 1.442695, %v1527_v26 }
 0xd5c   : > { %2369 = vpow2.f32 %v1530_v27 }
 0xd5d   : > { %v2364_v54 = vpop.eup %2363 }
 0xd5e   : > { %v1410_v28 = vsel %vm693_vm2, %v2364_v54, 0.0 }
 0xd5f   : > { %1411 = vadd.xlane.f32.xlu1 %v1410_v28 }
 0xd61   : > { %v2366_v29 = vpop.eup %2365 }
 0xd62   : > { %v1413_v30 = vsel %vm693_vm2, %v2366_v29, 0.0 }
 0xd63   : > { %1414 = vadd.xlane.f32.xlu0 %v1413_v30 }
 0xd65   : > { %v2368_v33 = vpop.eup %2367 }
 0xd66   : > { %v1532_v34 = vsel %vm693_vm2, %v2368_v33, 0.0 }
 0xd67   : > { %1533 = vadd.xlane.f32.xlu1 %v1532_v34 }
 0xd69   : > { %v2370_v35 = vpop.eup %2369 }
 0xd6a   : > { %v1535_v36 = vsel %vm693_vm2, %v2370_v35, 0.0 }
 0xd6b   : > { %1536 = vadd.xlane.f32.xlu0 %v1535_v36 }
 0xd78   : > { %1421 = vrot.lane.b32.xlu1 %v2694_v58, %s2404_s26 }
 0xd81   : > { %1543 = vrot.lane.b32.xlu0 %v2694_v58, %s2405_s21  ;;  %s2837_s21 = smov 16  }
 0xde8   : > { %v1412_v37 = vpop.xlane.xlu1 %1411 }
 0xde9   : > { %2371 = vrcp.f32 %v1412_v37 }
 0xdec   : > { %v1415_v38 = vpop.xlane.xlu0 %1414 }
 0xded   : > { %2373 = vrcp.f32 %v1415_v38  ;;  %v2086_v38 = vld [vmem:[%s2822_s8 + $0x1] ss:$0 sm:$0xff] }
 0xdf0   : > { %v1534_v39 = vpop.xlane.xlu1 %1533 }
 0xdf1   : > { %2375 = vrcp.f32 %v1534_v39 }
 0xdf4   : > { %v1422_v40 = vpop.permute.xlu1 %1421  ;;  %v1537_v41 = vpop.xlane.xlu0 %1536 }
 0xdf5   : > { %2377 = vrcp.f32 %v1537_v41  ;;  %2240 = vmatpush3.bf16.msra.mxu1 %v1422_v40 }
 0xdf6   : > { %2251 = vmatprep.subr.bf16.mxu1 %v2399_v15  ;;  %v2372_v42 = vpop.eup %2371 }
 0xdf7   : > { %v1418_v44 = vmul.f32 %v2372_v42, %v2364_v54  ;;  %v2326_v54 = vld [vmem:[%s2824_s10 + $0x10] sm:$0xff]   ;;  %v2087_v42 = vld [vmem:[%s2823_s9 + $0x1] ss:$0 sm:$0xff] }
 0xdf8   : > { %v1544_v49 = vpop.permute.xlu0 %1543 }
 0xdfa   : > { %v2374_v43 = vpop.eup %2373 }
 0xdfb   : > { %v1419_v47 = vmul.f32 %v2374_v43, %v2366_v29 }
 0xdfd   : > { %v1420_v48 = vpack.c.bf16 %v1419_v47, %v1418_v44 }
 0xdfe   : > { %v2376_v51 = vpop.eup %2375 }
 0xdff   : > { %2242 = vmatmul.mubr.msk.bf16.vlgmr.msra.gmra.mxu1 %vm693_vm2, %v1420_v48  ;;  %v1540_v53 = vmul.f32 %v2376_v51, %v2368_v33  ;;  %v2328_v51 = vld [vmem:[%s2826_s12 + $0x30] sm:$0xff]  }
 0xe00   : > { %2252 = vmatpush3.bf16.msra.mxu1 %v1544_v49  ;;  %2253 = vmatprep.mubr.msk.bf16.mxu1 %vm2400_vm1, %v2399_v15  ;;  %v2327_v49 = vld [vmem:[%s2826_s12 + $0x38] sm:$0xff]  }
 0xe01   : > { %2265 = vmatprep.subr.bf16.mxu1 %v2399_v15 }
 0xe02   : > { %v2378_v52 = vpop.eup %2377 }
 0xe03   : > { %v1541_v55 = vmul.f32 %v2378_v52, %v2370_v35  ;;  %v2329_v52 = vld [vmem:[%s2826_s12 + $0x28] sm:$0xff]  }
 0xe05   : > { %v1542_v56 = vpack.c.bf16 %v1541_v55, %v1540_v53  ;;  %v2330_v53 = vld [vmem:[%s2826_s12 + $0x20] sm:$0xff]  }
 0xe06   : > { %v2093_v55 = vld [vmem:[%s2825_s11 + $0x1] ss:$0 sm:$0xff] }
 0xe07   : > { %2254 = vmatmul.mubr.msk.bf16.vlgmr.msra.gmra.mxu1 %vm693_vm2, %v1542_v56 }
 0xe08   : > { %2269 = vmatprep.mubr.msk.bf16.mxu1 %vm2400_vm1, %v2399_v15 }
 0xebf   : > { %v1461_v58 = vpop.f32.mrf.mxu1 }
 0xec1   : > { %v2243_v59 = vpop.f32.mrf.mxu1 }
 0xec3   : > { %v1464_v61 = vpop.f32.mrf.mxu1 }
 0xec5   : > { %v2244_v62 = vpop.f32.mrf.mxu1 }
 0xec7   : > { %v1583_v63 = vpop.f32.mrf.mxu1 }
 0xec9   : > { %v2255_v0 = vpop.f32.mrf.mxu1 }
 0xecb   : > { %v1586_v1 = vpop.f32.mrf.mxu1 }
 0xecc   : > { %v2306_v2 = vpack.i.bf16 %v1586_v1, %v1583_v63 }
 0xecd   : > { %v2256_v3 = vpop.f32.mrf.mxu1 }
 0xece   : > { %2307 = vrot.lane.b32.xlu1 %v2306_v2, %s2837_s21 }
 0xf40   : > { %v2308_v4 = vpop.permute.xlu1 %2307 }
 0xf41   : > { %v2310_v5 = vunpack.i.h.bf16 %v2308_v4  ;;  %v2309_v6 = vunpack.i.l.bf16 %v2308_v4 }
 0xf43   : > { %v1599_v7 = vsel %vm693_vm2, %v1464_v61, %v2310_v5  ;;  %v1598_v8 = vsel %vm693_vm2, %v1461_v58, %v2309_v6 }
 0xf44   : > { %v1605_v9 = vpack.c.bf16 %v1599_v7, %v1598_v8 }
 0xf46   : > { %2262 = vmatmul.mubr.msk.bf16.vlgmr.msra.gmra.mxu0 %vm574_vm0, %v1605_v9 }
 0xf47   : > { %2281 = vmatprep.mubr.msk.bf16.mxu0 %vm2400_vm1, %v2399_v15  ;;  %2274 = vmatpush3.bf16.msra.mxu0 %v2327_v49  ;;  %v2115_v49 = vld [vmem:[%s2829_s15 + $0x1] ss:$0 sm:$0xff] }
 0xf48   : > { %2275 = vmatprep.subr.bf16.mxu0 %v2399_v15 }
 0xf4b   : > { %2276 = vmatpush3.bf16.msra.mxu0 %v2328_v51 }
 0xf4c   : > { %2277 = vmatprep.subr.bf16.mxu0 %v2399_v15 }
 0xf4f   : > { %2278 = vmatpush3.bf16.msra.mxu0 %v2329_v52 }
 0xf50   : > { %2279 = vmatprep.subr.bf16.mxu0 %v2399_v15 }
 0xf53   : > { %2280 = vmatpush3.bf16.msra.mxu0 %v2330_v53 }
0x1006   : > { %v1663_v11 = vpop.f32.mrf.mxu0 }
0x1007   : > { %v1664_v12 = vadd.f32 %v2080_v10, %v1663_v11 }
0x1008   : > { %v2263_v13 = vpop.f32.mrf.mxu0 }
0x1009   : > { %v1670_v14 = vadd.f32 %v1664_v12, %v2682_v45 }
0x100a   : > { %v1666_v16 = vpop.f32.mrf.mxu0 }
0x100b   : > { %v1667_v31 = vadd.f32 %v2080_v10, %v1666_v16  ;;  %v1676_v17 = vsel %vm574_vm0, %v1670_v14, 0.0 }
0x100c   : > { %1677 = vadd.xlane.f32.xlu1 %v1676_v17  ;;  %v2264_v18 = vpop.f32.mrf.mxu0 }
0x100d   : > { %v1671_v32 = vadd.f32 %v1667_v31, %v2684_v46  ;;  %v2325_v46 = vld [vmem:[%s2824_s10 + $0x18] sm:$0xff]   ;;  %v2106_v31 = vld [vmem:[%s2827_s13 + $0x1] ss:$0 sm:$0xff] }
0x100e   : > { %2266 = vmatpush3.bf16.msra.mxu1 %v2325_v46 }
0x100f   : > { %v1679_v19 = vsel %vm574_vm0, %v1671_v32, 0.0  ;;  %2267 = vmatprep.subr.bf16.mxu1 %v2399_v15 }
0x1010   : > { %1680 = vadd.xlane.f32.xlu0 %v1679_v19 }
0x1012   : > { %2268 = vmatpush3.bf16.msra.mxu1 %v2326_v54 }
0x1095   : > { %v1678_v20 = vpop.xlane.xlu1 %1677 }
0x1096   : > { %v1682_v21 = vmul.f32 0.03125, %v1678_v20 }
0x1098   : > { %v1684_v22 = vsub.f32 %v1670_v14, %v1682_v21 }
0x1099   : > { %v1681_v23 = vpop.xlane.xlu0 %1680 }
0x109a   : > { %v1683_v50 = vmul.f32 0.03125, %v1681_v23  ;;  %v1686_v24 = vmul.f32 %v1684_v22, %v1684_v22 }
0x109c   : > { %v1685_v25 = vsub.f32 %v1671_v32, %v1683_v50  ;;  %v1688_v45 = vsel %vm574_vm0, %v1686_v24, 0.0 }
0x109d   : > { %1689 = vadd.xlane.f32.xlu0 %v1688_v45 }
0x109e   : > { %v1687_v26 = vmul.f32 %v1685_v25, %v1685_v25 }
0x10a0   : > { %v1691_v27 = vsel %vm574_vm0, %v1687_v26, 0.0 }
0x10a1   : > { %1692 = vadd.xlane.f32.xlu1 %v1691_v27 }
0x1126   : > { %v1690_v28 = vpop.xlane.xlu0 %1689 }
0x1127   : > { %v1694_v29 = vmul.f32 0.03125, %v1690_v28 }
0x1129   : > { %v1696_v30 = vadd.f32 1e-12, %v1694_v29 }
0x112a   : > { %v1693_v33 = vpop.xlane.xlu1 %1692 }
0x112b   : > { %2379 = vrsqrt.f32 %v1696_v30  ;;  %v1695_v34 = vmul.f32 0.03125, %v1693_v33 }
0x112d   : > { %v1697_v35 = vadd.f32 1e-12, %v1695_v34 }
0x112f   : > { %2381 = vrsqrt.f32 %v1697_v35 }
0x1138   : > { %v2380_v36 = vpop.eup %2379 }
0x1139   : > { %v1700_v37 = vmul.f32 %v2380_v36, %v1684_v22 }
0x113b   : > { %v1708_v41 = vmul.f32 %v2086_v38, %v1700_v37 }
0x113c   : > { %v2382_v39 = vpop.eup %2381 }
0x113d   : > { %v1701_v40 = vmul.f32 %v2382_v39, %v1685_v25  ;;  %v1716_v44 = vadd.f32 %v2087_v42, %v1708_v41 }
0x113f   : > { %v1709_v43 = vmul.f32 %v2086_v38, %v1701_v40 }
0x1141   : > { %v1717_v47 = vadd.f32 %v2087_v42, %v1709_v43  ;;  %v2114_v43 = vld [vmem:[%s2828_s14 + $0x1] ss:$0 sm:$0xff] }
0x1143   : > { %v1723_v48 = vpack.c.bf16 %v1717_v47, %v1716_v44 }
0x1145   : > { %2270 = vmatmul.mubr.msk.bf16.vlgmr.msra.gmra.mxu1 %vm574_vm0, %v1723_v48 }
0x1205   : > { %v1781_v56 = vpop.f32.mrf.mxu1 }
0x1206   : > { %v1782_v57 = vadd.f32 %v2093_v55, %v1781_v56 }
0x1207   : > { %v2271_v58 = vpop.f32.mrf.mxu1 }
0x1208   : > { %v1790_v59 = vmul.f32 0.044715, %v1782_v57  ;;  %v1788_v10 = vmul.f32 0.5, %v1782_v57 }
0x1209   : > { %v1784_v60 = vpop.f32.mrf.mxu1 }
0x120a   : > { %v1792_v61 = vmul.f32 %v1790_v59, %v1782_v57  ;;  %v1785_v62 = vadd.f32 %v2093_v55, %v1784_v60  ;;  %v2116_v55 = vld [vmem:[%s2830_s16] ss:$0 sm:$0xff] }
0x120b   : > { %v2272_v63 = vpop.f32.mrf.mxu1 }
0x120c   : > { %v1794_v0 = vmul.f32 %v1792_v61, %v1782_v57  ;;  %v1791_v1 = vmul.f32 0.044715, %v1785_v62  ;;  %v1789_v11 = vmul.f32 0.5, %v1785_v62 }
0x120e   : > { %v1796_v2 = vadd.f32 %v1794_v0, %v1782_v57  ;;  %v1793_v3 = vmul.f32 %v1791_v1, %v1785_v62 }
0x1210   : > { %v1798_v4 = vmul.f32 0.7978846, %v1796_v2  ;;  %v1795_v5 = vmul.f32 %v1793_v3, %v1785_v62 }
0x1212   : > { %2383 = vtanh.f32 %v1798_v4  ;;  %v1797_v15 = vadd.f32 %v1795_v5, %v1785_v62 }
0x1214   : > { %v1799_v6 = vmul.f32 0.7978846, %v1797_v15 }
0x1216   : > { %2385 = vtanh.f32 %v1799_v6 }
0x121f   : > { %v2384_v7 = vpop.eup %2383 }
0x1220   : > { %v1802_v8 = vadd.f32 1.0, %v2384_v7 }
0x1222   : > { %v1804_v13 = vmul.f32 %v1802_v8, %v1788_v10 }
0x1223   : > { %v2386_v9 = vpop.eup %2385 }
0x1224   : > { %v1803_v12 = vadd.f32 1.0, %v2386_v9 }
0x1226   : > { %v1805_v14 = vmul.f32 %v1803_v12, %v1789_v11 }
0x1228   : > { %v1815_v16 = vpack.c.bf16 %v1805_v14, %v1804_v13 }
0x122a   : > { %2282 = vmatmul.mubr.msk.bf16.vlgmr.msra.gmra.mxu0 %vm1183_vm3, %v1815_v16 }
0x12ea   : > { %v1885_v17 = vpop.f32.mrf.mxu0 }
0x12eb   : > { %v1886_v18 = vadd.f32 %v2106_v31, %v1885_v17 }
0x12ec   : > { %v2283_v32 = vpop.f32.mrf.mxu0 }
0x12ed   : > { %v1892_v19 = vadd.f32 %v1886_v18, %v1716_v44 }
0x12ee   : > { %v1888_v20 = vpop.f32.mrf.mxu0 }
0x12ef   : > { %v1889_v21 = vadd.f32 %v2106_v31, %v1888_v20  ;;  %v1898_v22 = vsel %vm574_vm0, %v1892_v19, 0.0 }
0x12f0   : > { %1899 = vadd.xlane.f32.xlu1 %v1898_v22  ;;  %v2284_v23 = vpop.f32.mrf.mxu0 }
0x12f1   : > { %v1893_v50 = vadd.f32 %v1889_v21, %v1717_v47 }
0x12f3   : > { %v1901_v24 = vsel %vm574_vm0, %v1893_v50, 0.0 }
0x12f4   : > { %1902 = vadd.xlane.f32.xlu0 %v1901_v24 }
0x1379   : > { %v1900_v25 = vpop.xlane.xlu1 %1899 }
0x137a   : > { %v1904_v45 = vmul.f32 0.03125, %v1900_v25 }
0x137c   : > { %v1906_v26 = vsub.f32 %v1892_v19, %v1904_v45 }
0x137d   : > { %v1903_v27 = vpop.xlane.xlu0 %1902 }
0x137e   : > { %v1905_v46 = vmul.f32 0.03125, %v1903_v27  ;;  %v1908_v54 = vmul.f32 %v1906_v26, %v1906_v26 }
0x1380   : > { %v1907_v28 = vsub.f32 %v1893_v50, %v1905_v46  ;;  %v1910_v29 = vsel %vm574_vm0, %v1908_v54, 0.0 }
0x1381   : > { %1911 = vadd.xlane.f32.xlu1 %v1910_v29 }
0x1382   : > { %v1909_v30 = vmul.f32 %v1907_v28, %v1907_v28 }
0x1384   : > { %v1913_v33 = vsel %vm574_vm0, %v1909_v30, 0.0 }
0x1385   : > { %1914 = vadd.xlane.f32.xlu0 %v1913_v33 }
0x140a   : > { %v1912_v34 = vpop.xlane.xlu1 %1911 }
0x140b   : > { %v1916_v35 = vmul.f32 0.03125, %v1912_v34 }
0x140d   : > { %v1918_v36 = vadd.f32 1e-12, %v1916_v35 }
0x140e   : > { %v1915_v37 = vpop.xlane.xlu0 %1914 }
0x140f   : > { %2387 = vrsqrt.f32 %v1918_v36  ;;  %v1917_v38 = vmul.f32 0.03125, %v1915_v37 }
0x1411   : > { %v1919_v39 = vadd.f32 1e-12, %v1917_v38 }
0x1413   : > { %2389 = vrsqrt.f32 %v1919_v39 }
0x141c   : > { %v2388_v40 = vpop.eup %2387 }
0x141d   : > { %v1922_v41 = vmul.f32 %v2388_v40, %v1906_v26 }
0x141f   : > { %v1930_v47 = vmul.f32 %v2114_v43, %v1922_v41 }
0x1420   : > { %v2390_v42 = vpop.eup %2389 }
0x1421   : > { %v1923_v44 = vmul.f32 %v2390_v42, %v1907_v28  ;;  %v1938_v52 = vadd.f32 %v2115_v49, %v1930_v47 }
0x1423   : > { %v1931_v48 = vmul.f32 %v2114_v43, %v1923_v44 }
0x1425   : > { %v1939_v51 = vadd.f32 %v2115_v49, %v1931_v48 }
0x1427   : > { %v1941_v53 = vrot.slane %v1939_v51, 7 }
0x1429   : > { %v1944_v56 = vsel %vm1943_vm4, %v1938_v52, %v1941_v53 }
0x142a   : > { %v1952_v57 = vmul.f32 %v2116_v55, %v1944_v56 }
0x142c   : > { %v1954_v58 = vsel %vm1953_vm5, %v1952_v57, 0.0 }
0x142d   : > { %1955 = vadd.xlane.f32.xlu0 %v1954_v58 }
0x14b6   : > { %v1956_v59 = vpop.xlane.xlu0 %1955 }
0x14b7   : > { %1958 = vst.msk [vmem:[%s566_s27] sm:$0x3] %vm1957_vm6, %v1956_v59 }
0x14b8 PF: > { %s27_s24 = sadd.s32 1, %s2397_s24  }
0x14b9   : > { %p24_p4 = scmp.ge.s32.totalorder %s27_s24, 4  }
0x14bb   :  { %26 = sbr.rel (!%p24_p4) target bundleno = 3 (0x3), region = 133 }

</bundles_post_ra>
